<compile_context>
chip_gen: v6e
topology: v6e:2x2x1
jax: 0.10.0
libtpu: 0.0.40
codegen_flags: <defaults>
</compile_context>

<pallas_src>
from functools import partial

import numpy as np
import jax
import jax.numpy as jnp
from jax.experimental import pallas as pl
from jax.experimental.pallas import tpu as pltpu


# ------------------------------ Pallas kernel -------------------------------

def lenet5_kernel(a1_ref, w1t_ref, b1_ref, w2t_ref, b2_ref,
                  wfc1_ref, bfc1_ref, wfc2_ref, bfc2_ref,
                  wfc3_ref, bfc3_ref, out_ref):
    f32, bf16 = jnp.float32, jnp.bfloat16
    B = out_ref.shape[0]                       # images handled in this grid step

    def mm(a, w):                              # bf16 MXU matmul, f32 accumulation
        return jnp.dot(a.astype(bf16), w, preferred_element_type=f32)

    # ---- conv1 + tanh.  Rows: parity*14B + ph*B + b ; cols: c*28 + ow.
    h1 = jnp.tanh(mm(a1_ref[...], w1t_ref[...]) + b1_ref[...])           # (28B, 168)

    # ---- pool1 rows = even + odd conv rows (two contiguous halves); the 1/4 average
    #      factor and the column pooling are folded into the conv2 weights.
    p1 = h1[:14 * B, :] + h1[14 * B:, :]                                  # (14B, 168)

    # ---- conv2 + tanh.  im2col = 5 contiguous row windows of p1 (rows j*B + b).
    acc2 = mm(p1[0:10 * B, :], w2t_ref[0])
    for kh in range(1, 5):
        acc2 = acc2 + mm(p1[kh * B:(kh + 10) * B, :], w2t_ref[kh])
    h2 = jnp.tanh(acc2 + b2_ref[...])                                     # (10B, 160)

    # ---- pool2 + flatten + FC1: one slab per pooled row (contiguous row pairs of h2);
    #      1/4 factor, column pooling and torch's (co,ph,pw) flatten order folded in wfc1.
    z1 = mm(h2[0:B, :] + h2[B:2 * B, :], wfc1_ref[0])
    for ph in range(1, 5):
        slab = (h2[2 * ph * B:(2 * ph + 1) * B, :] +
                h2[(2 * ph + 1) * B:(2 * ph + 2) * B, :])                 # (B, 160)
        z1 = z1 + mm(slab, wfc1_ref[ph])
    z1 = z1 + bfc1_ref[...]

    s1 = 0.5 * (jnp.tanh(0.5 * z1) + 1.0)                                 # sigmoid
    z2 = mm(s1, wfc2_ref[...]) + bfc2_ref[...]
    s2 = 0.5 * (jnp.tanh(0.5 * z2) + 1.0)                                 # sigmoid

    # ---- FC3 (lane-padded to 128; padded lanes biased to -1e30) + exact softmax.
    logits = mm(s2, wfc3_ref[...]) + bfc3_ref[...]                        # (B, 128)
    e = jnp.exp(logits - jnp.max(logits, axis=1, keepdims=True))
    out_ref[...] = e / jnp.sum(e, axis=1, keepdims=True)


# ------------------------- host-side constant builders ----------------------

def pack_params(params):
    """Pre-arrange weights into batch-independent, bf16, kernel-friendly operands."""
    f32 = np.float32

    # conv1 -> Toeplitz matrix: w1t[kh*32 + j, c*28 + ow] = conv1_w[c, 0, kh, j-ow]
    w1 = np.asarray(params["conv1_w"], f32)[:, 0]                         # (6, 5, 5)
    ind1 = np.zeros((5, 32, 28), f32)
    for kw in range(5):
        for ow in range(28):
            ind1[kw, ow + kw, ow] = 1.0
    w1t = np.einsum("ckv,vjo->kjco", w1, ind1).reshape(5 * 32, 6 * 28)
    b1 = np.repeat(np.asarray(params["conv1_b"], f32), 28).reshape(1, 6 * 28)

    # conv2 -> per-kh Toeplitz blocks with pool1 (0.25 avg + column pairing) folded in:
    # w2t[kh, c*28 + ow1, co*10 + ow2] = 0.25 * conv2_w[co, c, kh, ow1//2 - ow2]
    w2 = np.asarray(params["conv2_w"], f32)                               # (16, 6, 5, 5)
    ind2 = np.zeros((5, 28, 10), f32)
    for kw in range(5):
        for ow2 in range(10):
            ind2[kw, 2 * (ow2 + kw), ow2] = 1.0
            ind2[kw, 2 * (ow2 + kw) + 1, ow2] = 1.0
    w2t = 0.25 * np.einsum("ockv,vjw->kcjow", w2, ind2).reshape(5, 6 * 28, 16 * 10)
    b2 = np.repeat(np.asarray(params["conv2_b"], f32), 10).reshape(1, 16 * 10)

    # FC1 with pool2 (0.25 avg + column pairing) and torch's (co,ph,pw) flatten folded:
    # wfc1[ph, co*10 + ow2, j] = 0.25 * fc1_w[j, co*25 + ph*5 + ow2//2]
    fc1 = np.asarray(params["fc1_w"], f32).reshape(120, 16, 5, 5)         # (j, co, ph, pw)
    wfc1 = 0.25 * fc1[:, :, :, np.repeat(np.arange(5), 2)]                # (j, co, ph, ow2)
    wfc1 = wfc1.transpose(2, 1, 3, 0).reshape(5, 16 * 10, 120)
    bfc1 = np.asarray(params["fc1_b"], f32).reshape(1, 120)

    wfc2 = np.asarray(params["fc2_w"], f32).T                             # (120, 84)
    bfc2 = np.asarray(params["fc2_b"], f32).reshape(1, 84)

    # FC3 padded to 128 lanes; padded logits get a -1e30 bias so softmax ignores them.
    wfc3 = np.zeros((84, 128), f32)
    wfc3[:, :10] = np.asarray(params["fc3_w"], f32).T
    bfc3 = np.full((1, 128), -1e30, f32)
    bfc3[0, :10] = np.asarray(params["fc3_b"], f32)

    bf = jnp.bfloat16
    return dict(
        w1t=jnp.asarray(w1t, bf), b1=jnp.asarray(b1),
        w2t=jnp.asarray(w2t, bf), b2=jnp.asarray(b2),
        wfc1=jnp.asarray(wfc1, bf), bfc1=jnp.asarray(bfc1),
        wfc2=jnp.asarray(wfc2, bf), bfc2=jnp.asarray(bfc2),
        wfc3=jnp.asarray(wfc3, bf), bfc3=jnp.asarray(bfc3),
    )


# ------------------------------ call wrapper ---------------------------------

def _lenet5_call(a1, p, block, nb):
    in_specs = [
        pl.BlockSpec((28 * block, 160), lambda i: (i, 0)),     # input tile: per grid step
        pl.BlockSpec((160, 168), lambda i: (0, 0)),            # weights: VMEM-resident
        pl.BlockSpec((1, 168), lambda i: (0, 0)),
        pl.BlockSpec((5, 168, 160), lambda i: (0, 0, 0)),
        pl.BlockSpec((1, 160), lambda i: (0, 0)),
        pl.BlockSpec((5, 160, 120), lambda i: (0, 0, 0)),
        pl.BlockSpec((1, 120), lambda i: (0, 0)),
        pl.BlockSpec((120, 84), lambda i: (0, 0)),
        pl.BlockSpec((1, 84), lambda i: (0, 0)),
        pl.BlockSpec((84, 128), lambda i: (0, 0)),
        pl.BlockSpec((1, 128), lambda i: (0, 0)),
    ]
    return pl.pallas_call(
        lenet5_kernel,
        out_shape=jax.ShapeDtypeStruct((nb * block, 128), jnp.float32),
        grid_spec=pltpu.PrefetchScalarGridSpec(
            num_scalar_prefetch=0,
            grid=(nb,),
            in_specs=in_specs,
            out_specs=pl.BlockSpec((block, 128), lambda i: (i, 0)),
        ),
        compiler_params=pltpu.CompilerParams(
            dimension_semantics=("parallel",)),
    )(a1, p["w1t"], p["b1"], p["w2t"], p["b2"], p["wfc1"], p["bfc1"],
      p["wfc2"], p["bfc2"], p["wfc3"], p["bfc3"])


@partial(jax.jit, static_argnames=("block",))
def lenet5_forward(x, packed, *, block=8):
    """x: (B, 1, 32, 32) float32 -> (B, 10) softmax probabilities."""
    B = x.shape[0]
    assert block % 8 == 0 and B % block == 0, (B, block)
    nb = B // block
    x2 = x[:, 0]                                                          # (B, 32, 32)
    # conv1 im2col row patches, ordered (batch-block, parity, pool_row, image, kh)
    # so that pool1 and conv2 windows are contiguous row slices inside the kernel.
    a = jnp.stack([x2[:, kh:kh + 28, :] for kh in range(5)], axis=2)      # (B, 28, 5, 32)
    a = a.reshape(nb, block, 14, 2, 5, 32).transpose(0, 3, 2, 1, 4, 5)
    a1 = a.reshape(nb * 28 * block, 5 * 32).astype(jnp.bfloat16)
    out = _lenet5_call(a1, packed, block, nb)
    return out[:, :10]


# ------------------------------ params & reference ---------------------------

def init_params(key):
    ks = jax.random.split(key, 10)

    def u(k, shape, fan_in):
        bound = 1.0 / np.sqrt(fan_in)
        return jax.random.uniform(k, shape, jnp.float32, -bound, bound)

    return {
        "conv1_w": u(ks[0], (6, 1, 5, 5), 25),
        "conv1_b": u(ks[1], (6,), 25),
        "conv2_w": u(ks[2], (16, 6, 5, 5), 6 * 25),
        "conv2_b": u(ks[3], (16,), 6 * 25),
        "fc1_w": u(ks[4], (120, 400), 400),
        "fc1_b": u(ks[5], (120,), 400),
        "fc2_w": u(ks[6], (84, 120), 120),
        "fc2_b": u(ks[7], (84,), 120),
        "fc3_w": u(ks[8], (10, 84), 84),
        "fc3_b": u(ks[9], (10,), 84),
    }


def ref_forward_np(x, params):
    """Pure numpy reference of the PyTorch LeNet5 forward (float64)."""
    x = np.asarray(x, np.float64)
    p = {k: np.asarray(v, np.float64) for k, v in params.items()}

    def conv(x, w, b):
        Bn, C, H, W = x.shape
        O, _, k, _ = w.shape
        OH, OW = H - k + 1, W - k + 1
        out = np.zeros((Bn, O, OH, OW))
        for kh in range(k):
            for kw in range(k):
                out += np.einsum("bchw,oc->bohw",
                                 x[:, :, kh:kh + OH, kw:kw + OW], w[:, :, kh, kw])
        return out + b[None, :, None, None]

    def pool(x):
        Bn, C, H, W = x.shape
        return x.reshape(Bn, C, H // 2, 2, W // 2, 2).mean(axis=(3, 5))

    h = pool(np.tanh(conv(x, p["conv1_w"], p["conv1_b"])))
    h = pool(np.tanh(conv(h, p["conv2_w"], p["conv2_b"])))
    f = h.reshape(x.shape[0], -1)
    z = 1.0 / (1.0 + np.exp(-(f @ p["fc1_w"].T + p["fc1_b"])))
    z = 1.0 / (1.0 + np.exp(-(z @ p["fc2_w"].T + p["fc2_b"])))
    logits = z @ p["fc3_w"].T + p["fc3_b"]
    e = np.exp(logits - logits.max(axis=1, keepdims=True))
    return e / e.sum(axis=1, keepdims=True)


# ----------------------------------- main ------------------------------------

if __name__ == "__main__":
    key = jax.random.PRNGKey(0)
    pkey, xkey = jax.random.split(key)
    params = init_params(pkey)

    BATCH, BLOCK = 16, 8          # 2 grid steps; BLOCK would be 128+ in production
    # LeNet-5 requires 32x32 single-channel inputs (=> 16*5*5 = 400 flatten dim).
    x = jax.random.normal(xkey, (BATCH, 1, 32, 32), jnp.float32)

    packed = pack_params(params)  # batch-size independent
    out = jax.block_until_ready(lenet5_forward(x, packed, block=BLOCK))

    assert out.shape == (BATCH, 10), out.shape
    assert bool(jnp.all(jnp.isfinite(out)))
    assert bool(jnp.allclose(jnp.sum(out, axis=1), 1.0, atol=1e-3))

    ref = ref_forward_np(np.asarray(x), params)
    err = float(np.abs(np.asarray(out, np.float64) - ref).max())
    assert err < 2e-2, f"max abs error vs reference: {err}"

    print("KERNEL_OK")
</pallas_src>

<mosaic_0001>
module attributes {stable_mosaic.version = 11 : i64} {
  func.func @lenet5_kernel(%arg0: i32, %arg1: memref<224x160xbf16, #tpu.memory_space<vmem>>, %arg2: memref<160x168xbf16, #tpu.memory_space<vmem>>, %arg3: memref<1x168xf32, #tpu.memory_space<vmem>>, %arg4: memref<5x168x160xbf16, #tpu.memory_space<vmem>>, %arg5: memref<1x160xf32, #tpu.memory_space<vmem>>, %arg6: memref<5x160x120xbf16, #tpu.memory_space<vmem>>, %arg7: memref<1x120xf32, #tpu.memory_space<vmem>>, %arg8: memref<120x84xbf16, #tpu.memory_space<vmem>>, %arg9: memref<1x84xf32, #tpu.memory_space<vmem>>, %arg10: memref<84x128xbf16, #tpu.memory_space<vmem>>, %arg11: memref<1x128xf32, #tpu.memory_space<vmem>>, %arg12: memref<8x128xf32, #tpu.memory_space<vmem>>) attributes {dimension_semantics = [#tpu.dimension_semantics<parallel>], iteration_bounds = array<i64: 2>, scalar_prefetch = 0 : i64, scratch_operands = 0 : i64, tpu.core_type = #tpu.core_type<tc>, window_params = [{transform_indices = @transform_0, window_bounds = array<i64: 224, 160>}, {pipeline_mode = #tpu.pipeline_mode<synchronous>, transform_indices = @transform_1, window_bounds = array<i64: 160, 168>}, {pipeline_mode = #tpu.pipeline_mode<synchronous>, transform_indices = @transform_2, window_bounds = array<i64: 1, 168>}, {pipeline_mode = #tpu.pipeline_mode<synchronous>, transform_indices = @transform_3, window_bounds = array<i64: 5, 168, 160>}, {pipeline_mode = #tpu.pipeline_mode<synchronous>, transform_indices = @transform_4, window_bounds = array<i64: 1, 160>}, {pipeline_mode = #tpu.pipeline_mode<synchronous>, transform_indices = @transform_5, window_bounds = array<i64: 5, 160, 120>}, {pipeline_mode = #tpu.pipeline_mode<synchronous>, transform_indices = @transform_6, window_bounds = array<i64: 1, 120>}, {pipeline_mode = #tpu.pipeline_mode<synchronous>, transform_indices = @transform_7, window_bounds = array<i64: 120, 84>}, {pipeline_mode = #tpu.pipeline_mode<synchronous>, transform_indices = @transform_8, window_bounds = array<i64: 1, 84>}, {pipeline_mode = #tpu.pipeline_mode<synchronous>, transform_indices = @transform_9, window_bounds = array<i64: 84, 128>}, {pipeline_mode = #tpu.pipeline_mode<synchronous>, transform_indices = @transform_10, window_bounds = array<i64: 1, 128>}, {transform_indices = @transform_11, window_bounds = array<i64: 8, 128>}]} {
    %c0 = arith.constant 0 : index
    %c0_0 = arith.constant 0 : index
    %0 = vector.load %arg1[%c0, %c0_0] : memref<224x160xbf16, #tpu.memory_space<vmem>>, vector<224x160xbf16>
    %c0_1 = arith.constant 0 : index
    %c0_2 = arith.constant 0 : index
    %1 = vector.load %arg2[%c0_1, %c0_2] : memref<160x168xbf16, #tpu.memory_space<vmem>>, vector<160x168xbf16>
    %cst = arith.constant dense<0.000000e+00> : vector<224x168xf32>
    %2 = tpu.matmul %0, %1, %cst {dimension_numbers = #tpu.dot_dimension_numbers<[1], [0], [0], [1], [0, 0, 1, 1], [], []>} : vector<224x160xbf16>, vector<160x168xbf16>, vector<224x168xf32> -> vector<224x168xf32>
    %c0_3 = arith.constant 0 : index
    %c0_4 = arith.constant 0 : index
    %3 = vector.load %arg3[%c0_3, %c0_4] : memref<1x168xf32, #tpu.memory_space<vmem>>, vector<1x168xf32>
    %4 = vector.broadcast %3 : vector<1x168xf32> to vector<224x168xf32>
    %5 = arith.addf %2, %4 : vector<224x168xf32>
    %6 = math.tanh %5 : vector<224x168xf32>
    %7 = vector.extract_strided_slice %6 {offsets = [0, 0], sizes = [112, 168], strides = [1, 1]} : vector<224x168xf32> to vector<112x168xf32>
    %8 = vector.extract_strided_slice %6 {offsets = [112, 0], sizes = [112, 168], strides = [1, 1]} : vector<224x168xf32> to vector<112x168xf32>
    %9 = arith.addf %7, %8 : vector<112x168xf32>
    %10 = vector.extract_strided_slice %9 {offsets = [0, 0], sizes = [80, 168], strides = [1, 1]} : vector<112x168xf32> to vector<80x168xf32>
    %c0_5 = arith.constant 0 : index
    %c0_6 = arith.constant 0 : index
    %c0_7 = arith.constant 0 : index
    %11 = vector.load %arg4[%c0_5, %c0_6, %c0_7] : memref<5x168x160xbf16, #tpu.memory_space<vmem>>, vector<1x168x160xbf16>
    %12 = vector.shape_cast %11 : vector<1x168x160xbf16> to vector<168x160xbf16>
    %13 = arith.truncf %10 : vector<80x168xf32> to vector<80x168xbf16>
    %cst_8 = arith.constant dense<0.000000e+00> : vector<80x160xf32>
    %14 = tpu.matmul %13, %12, %cst_8 {dimension_numbers = #tpu.dot_dimension_numbers<[1], [0], [0], [1], [0, 0, 1, 1], [], []>} : vector<80x168xbf16>, vector<168x160xbf16>, vector<80x160xf32> -> vector<80x160xf32>
    %15 = vector.extract_strided_slice %9 {offsets = [8, 0], sizes = [80, 168], strides = [1, 1]} : vector<112x168xf32> to vector<80x168xf32>
    %c1 = arith.constant 1 : index
    %c0_9 = arith.constant 0 : index
    %c0_10 = arith.constant 0 : index
    %16 = vector.load %arg4[%c1, %c0_9, %c0_10] : memref<5x168x160xbf16, #tpu.memory_space<vmem>>, vector<1x168x160xbf16>
    %17 = vector.shape_cast %16 : vector<1x168x160xbf16> to vector<168x160xbf16>
    %18 = arith.truncf %15 : vector<80x168xf32> to vector<80x168xbf16>
    %cst_11 = arith.constant dense<0.000000e+00> : vector<80x160xf32>
    %19 = tpu.matmul %18, %17, %cst_11 {dimension_numbers = #tpu.dot_dimension_numbers<[1], [0], [0], [1], [0, 0, 1, 1], [], []>} : vector<80x168xbf16>, vector<168x160xbf16>, vector<80x160xf32> -> vector<80x160xf32>
    %20 = arith.addf %14, %19 : vector<80x160xf32>
    %21 = vector.extract_strided_slice %9 {offsets = [16, 0], sizes = [80, 168], strides = [1, 1]} : vector<112x168xf32> to vector<80x168xf32>
    %c2 = arith.constant 2 : index
    %c0_12 = arith.constant 0 : index
    %c0_13 = arith.constant 0 : index
    %22 = vector.load %arg4[%c2, %c0_12, %c0_13] : memref<5x168x160xbf16, #tpu.memory_space<vmem>>, vector<1x168x160xbf16>
    %23 = vector.shape_cast %22 : vector<1x168x160xbf16> to vector<168x160xbf16>
    %24 = arith.truncf %21 : vector<80x168xf32> to vector<80x168xbf16>
    %cst_14 = arith.constant dense<0.000000e+00> : vector<80x160xf32>
    %25 = tpu.matmul %24, %23, %cst_14 {dimension_numbers = #tpu.dot_dimension_numbers<[1], [0], [0], [1], [0, 0, 1, 1], [], []>} : vector<80x168xbf16>, vector<168x160xbf16>, vector<80x160xf32> -> vector<80x160xf32>
    %26 = arith.addf %20, %25 : vector<80x160xf32>
    %27 = vector.extract_strided_slice %9 {offsets = [24, 0], sizes = [80, 168], strides = [1, 1]} : vector<112x168xf32> to vector<80x168xf32>
    %c3 = arith.constant 3 : index
    %c0_15 = arith.constant 0 : index
    %c0_16 = arith.constant 0 : index
    %28 = vector.load %arg4[%c3, %c0_15, %c0_16] : memref<5x168x160xbf16, #tpu.memory_space<vmem>>, vector<1x168x160xbf16>
    %29 = vector.shape_cast %28 : vector<1x168x160xbf16> to vector<168x160xbf16>
    %30 = arith.truncf %27 : vector<80x168xf32> to vector<80x168xbf16>
    %cst_17 = arith.constant dense<0.000000e+00> : vector<80x160xf32>
    %31 = tpu.matmul %30, %29, %cst_17 {dimension_numbers = #tpu.dot_dimension_numbers<[1], [0], [0], [1], [0, 0, 1, 1], [], []>} : vector<80x168xbf16>, vector<168x160xbf16>, vector<80x160xf32> -> vector<80x160xf32>
    %32 = arith.addf %26, %31 : vector<80x160xf32>
    %33 = vector.extract_strided_slice %9 {offsets = [32, 0], sizes = [80, 168], strides = [1, 1]} : vector<112x168xf32> to vector<80x168xf32>
    %c4 = arith.constant 4 : index
    %c0_18 = arith.constant 0 : index
    %c0_19 = arith.constant 0 : index
    %34 = vector.load %arg4[%c4, %c0_18, %c0_19] : memref<5x168x160xbf16, #tpu.memory_space<vmem>>, vector<1x168x160xbf16>
    %35 = vector.shape_cast %34 : vector<1x168x160xbf16> to vector<168x160xbf16>
    %36 = arith.truncf %33 : vector<80x168xf32> to vector<80x168xbf16>
    %cst_20 = arith.constant dense<0.000000e+00> : vector<80x160xf32>
    %37 = tpu.matmul %36, %35, %cst_20 {dimension_numbers = #tpu.dot_dimension_numbers<[1], [0], [0], [1], [0, 0, 1, 1], [], []>} : vector<80x168xbf16>, vector<168x160xbf16>, vector<80x160xf32> -> vector<80x160xf32>
    %38 = arith.addf %32, %37 : vector<80x160xf32>
    %c0_21 = arith.constant 0 : index
    %c0_22 = arith.constant 0 : index
    %39 = vector.load %arg5[%c0_21, %c0_22] : memref<1x160xf32, #tpu.memory_space<vmem>>, vector<1x160xf32>
    %40 = vector.broadcast %39 : vector<1x160xf32> to vector<80x160xf32>
    %41 = arith.addf %38, %40 : vector<80x160xf32>
    %42 = math.tanh %41 : vector<80x160xf32>
    %43 = vector.extract_strided_slice %42 {offsets = [0, 0], sizes = [8, 160], strides = [1, 1]} : vector<80x160xf32> to vector<8x160xf32>
    %44 = vector.extract_strided_slice %42 {offsets = [8, 0], sizes = [8, 160], strides = [1, 1]} : vector<80x160xf32> to vector<8x160xf32>
    %45 = arith.addf %43, %44 : vector<8x160xf32>
    %c0_23 = arith.constant 0 : index
    %c0_24 = arith.constant 0 : index
    %c0_25 = arith.constant 0 : index
    %46 = vector.load %arg6[%c0_23, %c0_24, %c0_25] : memref<5x160x120xbf16, #tpu.memory_space<vmem>>, vector<1x160x120xbf16>
    %47 = vector.shape_cast %46 : vector<1x160x120xbf16> to vector<160x120xbf16>
    %48 = arith.truncf %45 : vector<8x160xf32> to vector<8x160xbf16>
    %cst_26 = arith.constant dense<0.000000e+00> : vector<8x120xf32>
    %49 = tpu.matmul %48, %47, %cst_26 {dimension_numbers = #tpu.dot_dimension_numbers<[1], [0], [0], [1], [0, 0, 1, 1], [], []>} : vector<8x160xbf16>, vector<160x120xbf16>, vector<8x120xf32> -> vector<8x120xf32>
    %50 = vector.extract_strided_slice %42 {offsets = [16, 0], sizes = [8, 160], strides = [1, 1]} : vector<80x160xf32> to vector<8x160xf32>
    %51 = vector.extract_strided_slice %42 {offsets = [24, 0], sizes = [8, 160], strides = [1, 1]} : vector<80x160xf32> to vector<8x160xf32>
    %52 = arith.addf %50, %51 : vector<8x160xf32>
    %c1_27 = arith.constant 1 : index
    %c0_28 = arith.constant 0 : index
    %c0_29 = arith.constant 0 : index
    %53 = vector.load %arg6[%c1_27, %c0_28, %c0_29] : memref<5x160x120xbf16, #tpu.memory_space<vmem>>, vector<1x160x120xbf16>
    %54 = vector.shape_cast %53 : vector<1x160x120xbf16> to vector<160x120xbf16>
    %55 = arith.truncf %52 : vector<8x160xf32> to vector<8x160xbf16>
    %cst_30 = arith.constant dense<0.000000e+00> : vector<8x120xf32>
    %56 = tpu.matmul %55, %54, %cst_30 {dimension_numbers = #tpu.dot_dimension_numbers<[1], [0], [0], [1], [0, 0, 1, 1], [], []>} : vector<8x160xbf16>, vector<160x120xbf16>, vector<8x120xf32> -> vector<8x120xf32>
    %57 = arith.addf %49, %56 : vector<8x120xf32>
    %58 = vector.extract_strided_slice %42 {offsets = [32, 0], sizes = [8, 160], strides = [1, 1]} : vector<80x160xf32> to vector<8x160xf32>
    %59 = vector.extract_strided_slice %42 {offsets = [40, 0], sizes = [8, 160], strides = [1, 1]} : vector<80x160xf32> to vector<8x160xf32>
    %60 = arith.addf %58, %59 : vector<8x160xf32>
    %c2_31 = arith.constant 2 : index
    %c0_32 = arith.constant 0 : index
    %c0_33 = arith.constant 0 : index
    %61 = vector.load %arg6[%c2_31, %c0_32, %c0_33] : memref<5x160x120xbf16, #tpu.memory_space<vmem>>, vector<1x160x120xbf16>
    %62 = vector.shape_cast %61 : vector<1x160x120xbf16> to vector<160x120xbf16>
    %63 = arith.truncf %60 : vector<8x160xf32> to vector<8x160xbf16>
    %cst_34 = arith.constant dense<0.000000e+00> : vector<8x120xf32>
    %64 = tpu.matmul %63, %62, %cst_34 {dimension_numbers = #tpu.dot_dimension_numbers<[1], [0], [0], [1], [0, 0, 1, 1], [], []>} : vector<8x160xbf16>, vector<160x120xbf16>, vector<8x120xf32> -> vector<8x120xf32>
    %65 = arith.addf %57, %64 : vector<8x120xf32>
    %66 = vector.extract_strided_slice %42 {offsets = [48, 0], sizes = [8, 160], strides = [1, 1]} : vector<80x160xf32> to vector<8x160xf32>
    %67 = vector.extract_strided_slice %42 {offsets = [56, 0], sizes = [8, 160], strides = [1, 1]} : vector<80x160xf32> to vector<8x160xf32>
    %68 = arith.addf %66, %67 : vector<8x160xf32>
    %c3_35 = arith.constant 3 : index
    %c0_36 = arith.constant 0 : index
    %c0_37 = arith.constant 0 : index
    %69 = vector.load %arg6[%c3_35, %c0_36, %c0_37] : memref<5x160x120xbf16, #tpu.memory_space<vmem>>, vector<1x160x120xbf16>
    %70 = vector.shape_cast %69 : vector<1x160x120xbf16> to vector<160x120xbf16>
    %71 = arith.truncf %68 : vector<8x160xf32> to vector<8x160xbf16>
    %cst_38 = arith.constant dense<0.000000e+00> : vector<8x120xf32>
    %72 = tpu.matmul %71, %70, %cst_38 {dimension_numbers = #tpu.dot_dimension_numbers<[1], [0], [0], [1], [0, 0, 1, 1], [], []>} : vector<8x160xbf16>, vector<160x120xbf16>, vector<8x120xf32> -> vector<8x120xf32>
    %73 = arith.addf %65, %72 : vector<8x120xf32>
    %74 = vector.extract_strided_slice %42 {offsets = [64, 0], sizes = [8, 160], strides = [1, 1]} : vector<80x160xf32> to vector<8x160xf32>
    %75 = vector.extract_strided_slice %42 {offsets = [72, 0], sizes = [8, 160], strides = [1, 1]} : vector<80x160xf32> to vector<8x160xf32>
    %76 = arith.addf %74, %75 : vector<8x160xf32>
    %c4_39 = arith.constant 4 : index
    %c0_40 = arith.constant 0 : index
    %c0_41 = arith.constant 0 : index
    %77 = vector.load %arg6[%c4_39, %c0_40, %c0_41] : memref<5x160x120xbf16, #tpu.memory_space<vmem>>, vector<1x160x120xbf16>
    %78 = vector.shape_cast %77 : vector<1x160x120xbf16> to vector<160x120xbf16>
    %79 = arith.truncf %76 : vector<8x160xf32> to vector<8x160xbf16>
    %cst_42 = arith.constant dense<0.000000e+00> : vector<8x120xf32>
    %80 = tpu.matmul %79, %78, %cst_42 {dimension_numbers = #tpu.dot_dimension_numbers<[1], [0], [0], [1], [0, 0, 1, 1], [], []>} : vector<8x160xbf16>, vector<160x120xbf16>, vector<8x120xf32> -> vector<8x120xf32>
    %81 = arith.addf %73, %80 : vector<8x120xf32>
    %c0_43 = arith.constant 0 : index
    %c0_44 = arith.constant 0 : index
    %82 = vector.load %arg7[%c0_43, %c0_44] : memref<1x120xf32, #tpu.memory_space<vmem>>, vector<1x120xf32>
    %83 = vector.broadcast %82 : vector<1x120xf32> to vector<8x120xf32>
    %84 = arith.addf %81, %83 : vector<8x120xf32>
    %cst_45 = arith.constant 5.000000e-01 : f32
    %85 = vector.broadcast %cst_45 : f32 to vector<8x120xf32>
    %86 = arith.mulf %85, %84 : vector<8x120xf32>
    %87 = math.tanh %86 : vector<8x120xf32>
    %cst_46 = arith.constant 1.000000e+00 : f32
    %88 = vector.broadcast %cst_46 : f32 to vector<8x120xf32>
    %89 = arith.addf %87, %88 : vector<8x120xf32>
    %cst_47 = arith.constant 5.000000e-01 : f32
    %90 = vector.broadcast %cst_47 : f32 to vector<8x120xf32>
    %91 = arith.mulf %90, %89 : vector<8x120xf32>
    %c0_48 = arith.constant 0 : index
    %c0_49 = arith.constant 0 : index
    %92 = vector.load %arg8[%c0_48, %c0_49] : memref<120x84xbf16, #tpu.memory_space<vmem>>, vector<120x84xbf16>
    %93 = arith.truncf %91 : vector<8x120xf32> to vector<8x120xbf16>
    %cst_50 = arith.constant dense<0.000000e+00> : vector<8x84xf32>
    %94 = tpu.matmul %93, %92, %cst_50 {dimension_numbers = #tpu.dot_dimension_numbers<[1], [0], [0], [1], [0, 0, 1, 1], [], []>} : vector<8x120xbf16>, vector<120x84xbf16>, vector<8x84xf32> -> vector<8x84xf32>
    %c0_51 = arith.constant 0 : index
    %c0_52 = arith.constant 0 : index
    %95 = vector.load %arg9[%c0_51, %c0_52] : memref<1x84xf32, #tpu.memory_space<vmem>>, vector<1x84xf32>
    %96 = vector.broadcast %95 : vector<1x84xf32> to vector<8x84xf32>
    %97 = arith.addf %94, %96 : vector<8x84xf32>
    %cst_53 = arith.constant 5.000000e-01 : f32
    %98 = vector.broadcast %cst_53 : f32 to vector<8x84xf32>
    %99 = arith.mulf %98, %97 : vector<8x84xf32>
    %100 = math.tanh %99 : vector<8x84xf32>
    %cst_54 = arith.constant 1.000000e+00 : f32
    %101 = vector.broadcast %cst_54 : f32 to vector<8x84xf32>
    %102 = arith.addf %100, %101 : vector<8x84xf32>
    %cst_55 = arith.constant 5.000000e-01 : f32
    %103 = vector.broadcast %cst_55 : f32 to vector<8x84xf32>
    %104 = arith.mulf %103, %102 : vector<8x84xf32>
    %c0_56 = arith.constant 0 : index
    %c0_57 = arith.constant 0 : index
    %105 = vector.load %arg10[%c0_56, %c0_57] : memref<84x128xbf16, #tpu.memory_space<vmem>>, vector<84x128xbf16>
    %106 = arith.truncf %104 : vector<8x84xf32> to vector<8x84xbf16>
    %cst_58 = arith.constant dense<0.000000e+00> : vector<8x128xf32>
    %107 = tpu.matmul %106, %105, %cst_58 {dimension_numbers = #tpu.dot_dimension_numbers<[1], [0], [0], [1], [0, 0, 1, 1], [], []>} : vector<8x84xbf16>, vector<84x128xbf16>, vector<8x128xf32> -> vector<8x128xf32>
    %c0_59 = arith.constant 0 : index
    %c0_60 = arith.constant 0 : index
    %108 = vector.load %arg11[%c0_59, %c0_60] : memref<1x128xf32, #tpu.memory_space<vmem>>, vector<1x128xf32>
    %109 = vector.broadcast %108 : vector<1x128xf32> to vector<8x128xf32>
    %110 = arith.addf %107, %109 : vector<8x128xf32>
    %cst_61 = arith.constant dense<0xFF800000> : vector<8xf32>
    %111 = vector.multi_reduction <maximumf>, %110, %cst_61 [1] : vector<8x128xf32> to vector<8xf32>
    %112 = vector.shape_cast %111 : vector<8xf32> to vector<8x1xf32>
    %113 = vector.broadcast %112 : vector<8x1xf32> to vector<8x128xf32>
    %114 = arith.subf %110, %113 : vector<8x128xf32>
    %115 = math.exp %114 : vector<8x128xf32>
    %cst_62 = arith.constant dense<0.000000e+00> : vector<8xf32>
    %116 = vector.multi_reduction <add>, %115, %cst_62 [1] : vector<8x128xf32> to vector<8xf32>
    %117 = vector.shape_cast %116 : vector<8xf32> to vector<8x1xf32>
    %118 = vector.broadcast %117 : vector<8x1xf32> to vector<8x128xf32>
    %119 = arith.divf %115, %118 : vector<8x128xf32>
    %c0_63 = arith.constant 0 : index
    %c0_64 = arith.constant 0 : index
    %120 = vector.load %arg12[%c0_63, %c0_64] : memref<8x128xf32, #tpu.memory_space<vmem>>, vector<8x128xf32>
    tpu.vector_store %arg12[%c0_63, %c0_64], %119 {strides = array<i32>} : memref<8x128xf32, #tpu.memory_space<vmem>>, vector<8x128xf32>,
    return
  }
  func.func @transform_0(%arg0: i32) -> (i32, i32) {
    %c0_i32 = arith.constant 0 : i32
    %c0_i32_0 = arith.constant 0 : i32
    return %arg0, %c0_i32 : i32, i32
  }
  func.func @transform_1(%arg0: i32) -> (i32, i32) {
    %c0_i32 = arith.constant 0 : i32
    %c0_i32_0 = arith.constant 0 : i32
    %c0_i32_1 = arith.constant 0 : i32
    return %c0_i32, %c0_i32_0 : i32, i32
  }
  func.func @transform_2(%arg0: i32) -> (i32, i32) {
    %c0_i32 = arith.constant 0 : i32
    %c0_i32_0 = arith.constant 0 : i32
    %c0_i32_1 = arith.constant 0 : i32
    return %c0_i32, %c0_i32_0 : i32, i32
  }
  func.func @transform_3(%arg0: i32) -> (i32, i32, i32) {
    %c0_i32 = arith.constant 0 : i32
    %c0_i32_0 = arith.constant 0 : i32
    %c0_i32_1 = arith.constant 0 : i32
    %c0_i32_2 = arith.constant 0 : i32
    return %c0_i32, %c0_i32_0, %c0_i32_1 : i32, i32, i32
  }
  func.func @transform_4(%arg0: i32) -> (i32, i32) {
    %c0_i32 = arith.constant 0 : i32
    %c0_i32_0 = arith.constant 0 : i32
    %c0_i32_1 = arith.constant 0 : i32
    return %c0_i32, %c0_i32_0 : i32, i32
  }
  func.func @transform_5(%arg0: i32) -> (i32, i32, i32) {
    %c0_i32 = arith.constant 0 : i32
    %c0_i32_0 = arith.constant 0 : i32
    %c0_i32_1 = arith.constant 0 : i32
    %c0_i32_2 = arith.constant 0 : i32
    return %c0_i32, %c0_i32_0, %c0_i32_1 : i32, i32, i32
  }
  func.func @transform_6(%arg0: i32) -> (i32, i32) {
    %c0_i32 = arith.constant 0 : i32
    %c0_i32_0 = arith.constant 0 : i32
    %c0_i32_1 = arith.constant 0 : i32
    return %c0_i32, %c0_i32_0 : i32, i32
  }
  func.func @transform_7(%arg0: i32) -> (i32, i32) {
    %c0_i32 = arith.constant 0 : i32
    %c0_i32_0 = arith.constant 0 : i32
    %c0_i32_1 = arith.constant 0 : i32
    return %c0_i32, %c0_i32_0 : i32, i32
  }
  func.func @transform_8(%arg0: i32) -> (i32, i32) {
    %c0_i32 = arith.constant 0 : i32
    %c0_i32_0 = arith.constant 0 : i32
    %c0_i32_1 = arith.constant 0 : i32
    return %c0_i32, %c0_i32_0 : i32, i32
  }
  func.func @transform_9(%arg0: i32) -> (i32, i32) {
    %c0_i32 = arith.constant 0 : i32
    %c0_i32_0 = arith.constant 0 : i32
    %c0_i32_1 = arith.constant 0 : i32
    return %c0_i32, %c0_i32_0 : i32, i32
  }
  func.func @transform_10(%arg0: i32) -> (i32, i32) {
    %c0_i32 = arith.constant 0 : i32
    %c0_i32_0 = arith.constant 0 : i32
    %c0_i32_1 = arith.constant 0 : i32
    return %c0_i32, %c0_i32_0 : i32, i32
  }
  func.func @transform_11(%arg0: i32) -> (i32, i32) {
    %c0_i32 = arith.constant 0 : i32
    %c0_i32_0 = arith.constant 0 : i32
    return %arg0, %c0_i32 : i32, i32
  }
}

</mosaic_0001>

<bundles_post_ra>
// kernel: lenet5_forward.1
= control target key start
LH: loop header
LB: loop body
LE: loop exit
PB: predicated region body
PF: predicated region fallthrough
CT: control target
= control target key end

     0   :  { %s5554_s0 = inlined_call_operand.vmem [shape: bf16[448,160], index: 0, kind: input, shape index: {}]   ;;  %s5555_s1 = inlined_call_operand.vmem [shape: bf16[160,168], index: 1, kind: input, shape index: {}]   ;;  %s5556_s2 = inlined_call_operand.vmem [shape: f32[1,168], index: 2, kind: input, shape index: {}]   ;;  %s5557_s3 = inlined_call_operand.vmem [shape: bf16[5,168,160], index: 3, kind: input, shape index: {}]   ;;  %s5558_s4 = inlined_call_operand.vmem [shape: f32[1,160], index: 4, kind: input, shape index: {}]   ;;  %s5559_s5 = inlined_call_operand.vmem [shape: bf16[5,160,120], index: 5, kind: input, shape index: {}]   ;;  %s5560_s6 = inlined_call_operand.vmem [shape: f32[1,120], index: 6, kind: input, shape index: {}]   ;;  %s5561_s7 = inlined_call_operand.vmem [shape: bf16[120,84], index: 7, kind: input, shape index: {}]   ;;  %s5562_s8 = inlined_call_operand.vmem [shape: f32[1,84], index: 8, kind: input, shape index: {}]   ;;  %s5563_s9 = inlined_call_operand.vmem [shape: bf16[84,128], index: 9, kind: input, shape index: {}]   ;;  %s5564_s10 = inlined_call_operand.vmem [shape: f32[1,128], index: 10, kind: input, shape index: {}]   ;;  %s5565_s11 = inlined_call_operand.hbm [shape: f32[16,128], index: 11, kind: output, shape index: {}]  }
   0x1   :  { %5566 = sst [smem:[#allocation6_spill]] %s5554_s0 }
   0x2   :  { %16 = vsyncpa [#allocation3], 0 }
   0x3   :  { %18 = vsyncpa [#allocation3 + $0x1], 0  ;;  %s4319_s17 = smov 0   ;;  %s4321_s18 = smov 0  }
   0x4   :  { %s4323_s19 = smov 0   ;;  %s4325_s20 = smov 0  }
   0x5 LB: > { %s4340_s21 = sadd.s32 4294967295, %s4253_s20   ;;  %s3191_s22 = sadd.s32 4294967294, %s4253_s20   ;;  %s4253_s20 = sphi %s4325_s20, %s5575_s20   ;;  %s4249_s19 = sphi %s4323_s19, %s5574_s19   ;;  %s4245_s18 = sphi %s4321_s18, %s5573_s18   ;;  %s4241_s17 = sphi %s4319_s17, %s5572_s17  }
   0x6   : > { %s4344_s23 = sadd.s32 1, %s4253_s20   ;;  %s267_s24 = sadd.s32 1, %s4249_s19 }
   0x7   : > { %s264_s25 = ssub.s32 %s4253_s20, %s4344_s23  ;;  %p277_p0 = scmp.ne.s32.totalorder %s4249_s19, %s4245_s18 }
   0x8   : > { %p265_p1 = scmp.eq.s32.totalorder %s264_s25, 0  ;;  %p278_p2 = scmp.eq.s32.totalorder %s4340_s21, 1 }
   0x9   : > { %p283_p3 = scmp.ne.s32.totalorder %s4245_s18, %s4241_s17  ;;  %p284_p4 = scmp.eq.s32.totalorder %s3191_s22, 1 }
   0xa   : > { %s4355_s26 = scalar_select %p265_p1, %s4249_s19, %s267_s24  }
   0xb   : > { %p4357_p5 = por %p278_p2, %p277_p0  ;;  %p4361_p6 = por %p284_p4, %p283_p3 }
   0xc   : > { %5567 = sst [smem:[#allocation5_spill]] %s4355_s26  ;;  %p3194_p7 = scmp.ge.s32.totalorder %s4253_s20, 1 }
   0xd   : > { %p342_p8 = scmp.lt.s32.totalorder %s4253_s20, 3 }
   0xf   : > { %p343_p9 = pnand %p3194_p7, %p342_p8 }
  0x10   : > { %s383_s12 = smul.u32 (!%p343_p9), 28, %s4340_s21  ;;  %s5570_s0 = sld [smem:[#allocation6_spill]] (!%p343_p9) }
  0x11   : > { %346 = sbr.rel (%p343_p9) target bundleno = 1739 (0x6cb), region = 64  ;;  %s380_s13 = sand.u32 (!%p343_p9), 1, %s4245_s18  }
  0x12   : > { %p384_p10 = scmp.lt.s32.totalorder (!%p343_p9), %s383_s12, 55  ;;  %s3119_s24 = scalar_lea.sflag (!%p343_p9), [#allocation3], %s380_s13 }
  0x13   : > { %s4258_s30 = smov (!%p343_p9), [#allocation2]  }
  0x16   : > { %v3737_v0 = vld [vmem:[%s5555_s1 + $0x74] ss:$8 sps:$4 sm:$0xff]   ;;  %v3739_v1 = vld [vmem:[%s5555_s1 + $0x70] ss:$8 sps:$4 sm:$0xff]   ;;  %v3740_v2 = vld [vmem:[%s5555_s1 + $0x64] ss:$8 sps:$4 sm:$0xff]  }
  0x17   : > { %720 = vmatprep.subr.bf16.mxu0 %v3737_v0  ;;  %v3742_v3 = vld [vmem:[%s5555_s1 + $0x60] ss:$8 sps:$4 sm:$0xff]   ;;  %v3743_v4 = vld [vmem:[%s5555_s1 + $0x54] ss:$8 sps:$4 sm:$0xff]   ;;  %s5577_s12 = smov (!%p384_p10, %s383_s12), 55  ;;  %vm677_vm0 = vcmask 261120  }
  0x18   : > { %721 = vmatpush1.bf16.msra.mxu0 %v3739_v1  ;;  %v3745_v5 = vld [vmem:[%s5555_s1 + $0x50] ss:$8 sps:$4 sm:$0xff]   ;;  %v3746_v6 = vld [vmem:[%s5555_s1 + $0x44] ss:$8 sps:$4 sm:$0xff]   ;;  %s3642_s16 = sshll.u32 %s5577_s12, 3  ;;  %vm1161_vm1 = vcmask 1043456  }
  0x19   : > { %722 = vmatprep.subr.bf16.mxu0 %v3740_v2  ;;  %v3748_v7 = vld [vmem:[%s5555_s1 + $0x40] ss:$8 sps:$4 sm:$0xff]   ;;  %s4395_s29 = scalar_lea.vmem %s5570_s0, %s3642_s16  ;;  %v3749_v8 = vld [vmem:[%s5555_s1 + $0x34] ss:$8 sps:$4 sm:$0xff]   ;;  %v3751_v10 = vld [vmem:[%s5555_s1 + $0x30] ss:$8 sps:$4 sm:$0xff]  }
  0x1a   : > { %v3769_v9 = vld [vmem:[%s4395_s29 + $0x4] ss:$8 sps:$4 sm:$0xff]   ;;  %v3754_v12 = vld [vmem:[%s5555_s1 + $0x20] ss:$8 sps:$4 sm:$0xff]   ;;  %v3755_v13 = vld [vmem:[%s5555_s1 + $0x14] ss:$8 sps:$4 sm:$0xff]  }
  0x1b   : > { %v3752_v11 = vld [vmem:[%s5555_s1 + $0x24] ss:$8 sps:$4 sm:$0xff]   ;;  %3246 = vmatprep.mubr.msk.bf16.mxu0 %vm677_vm0, %v3769_v9  ;;  %v3757_v14 = vld [vmem:[%s5555_s1 + $0x10] ss:$8 sps:$4 sm:$0xff]   ;;  %v3760_v16 = vld [vmem:[%s5555_s1] ss:$8 sps:$4 sm:$0xff]  }
  0x1c   : > { %723 = vmatpush1.bf16.msra.mxu0 %v3742_v3  ;;  %v3758_v15 = vld [vmem:[%s5555_s1 + $0x4] ss:$8 sps:$4 sm:$0xff]   ;;  %v3761_v17 = vld [vmem:[%s5555_s1 + $0x94] ss:$8 sps:$4 sm:$0xff]   ;;  %v3763_v18 = vld [vmem:[%s5555_s1 + $0x90] ss:$8 sps:$4 sm:$0xff]  }
  0x1d   : > { %724 = vmatprep.subr.bf16.mxu0 %v3743_v4  ;;  %v3764_v19 = vld [vmem:[%s5555_s1 + $0x84] ss:$8 sps:$4 sm:$0xff]   ;;  %v3766_v20 = vld [vmem:[%s5555_s1 + $0x80] ss:$8 sps:$4 sm:$0xff]   ;;  %v3770_v22 = vld [vmem:[%s4395_s29 + $0x14] ss:$8 sps:$4 sm:$0xff]  }
  0x1e   : > { %v3767_v21 = vld [vmem:[%s4395_s29] ss:$8 sps:$4 sm:$0xff]   ;;  %v3772_v23 = vld [vmem:[%s4395_s29 + $0x10] ss:$8 sps:$4 sm:$0xff]   ;;  %v3773_v24 = vld [vmem:[%s4395_s29 + $0x24] ss:$8 sps:$4 sm:$0xff]  }
  0x1f   : > { %v3775_v25 = vld [vmem:[%s4395_s29 + $0x20] ss:$8 sps:$4 sm:$0xff]   ;;  %v3776_v26 = vld [vmem:[%s4395_s29 + $0x34] ss:$8 sps:$4 sm:$0xff]   ;;  %v3778_v27 = vld [vmem:[%s4395_s29 + $0x30] ss:$8 sps:$4 sm:$0xff]  }
  0x20   : > { %725 = vmatpush1.bf16.msra.mxu0 %v3745_v5  ;;  %v3779_v28 = vld [vmem:[%s4395_s29 + $0x44] ss:$8 sps:$4 sm:$0xff]   ;;  %v3781_v29 = vld [vmem:[%s4395_s29 + $0x40] ss:$8 sps:$4 sm:$0xff]   ;;  %v3782_v30 = vld [vmem:[%s4395_s29 + $0x54] ss:$8 sps:$4 sm:$0xff]  }
  0x21   : > { %726 = vmatprep.subr.bf16.mxu0 %v3746_v6  ;;  %v3784_v31 = vld [vmem:[%s4395_s29 + $0x50] ss:$8 sps:$4 sm:$0xff]   ;;  %v3785_v32 = vld [vmem:[%s4395_s29 + $0x64] ss:$8 sps:$4 sm:$0xff]   ;;  %v3787_v33 = vld [vmem:[%s4395_s29 + $0x60] ss:$8 sps:$4 sm:$0xff]  }
  0x22   : > { %v3788_v34 = vld [vmem:[%s4395_s29 + $0x74] ss:$8 sps:$4 sm:$0xff]   ;;  %v3790_v35 = vld [vmem:[%s4395_s29 + $0x70] ss:$8 sps:$4 sm:$0xff]   ;;  %v3791_v36 = vld [vmem:[%s4395_s29 + $0x84] ss:$8 sps:$4 sm:$0xff]  }
  0x23   : > { %v3793_v37 = vld [vmem:[%s4395_s29 + $0x80] ss:$8 sps:$4 sm:$0xff]   ;;  %v3794_v38 = vld [vmem:[%s4395_s29 + $0x94] ss:$8 sps:$4 sm:$0xff]   ;;  %v3796_v39 = vld [vmem:[%s4395_s29 + $0x90] ss:$8 sps:$4 sm:$0xff]  }
  0x24   : > { %727 = vmatpush1.bf16.msra.mxu0 %v3748_v7  ;;  %v3797_v40 = vld [vmem:[%s4395_s29 + $0xa4] ss:$8 sps:$4 sm:$0xff]   ;;  %v3799_v41 = vld [vmem:[%s4395_s29 + $0xa0] ss:$8 sps:$4 sm:$0xff]   ;;  %v3800_v42 = vld [vmem:[%s4395_s29 + $0xb4] ss:$8 sps:$4 sm:$0xff]  }
  0x25   : > { %728 = vmatprep.subr.bf16.mxu0 %v3749_v8  ;;  %v3802_v43 = vld [vmem:[%s4395_s29 + $0xb0] ss:$8 sps:$4 sm:$0xff]   ;;  %v3803_v44 = vld [vmem:[%s4395_s29 + $0xc4] ss:$8 sps:$4 sm:$0xff]   ;;  %v3805_v45 = vld [vmem:[%s4395_s29 + $0xc0] ss:$8 sps:$4 sm:$0xff]  }
  0x26   : > { %v3806_v46 = vld [vmem:[%s4395_s29 + $0xd4] ss:$8 sps:$4 sm:$0xff]   ;;  %v3808_v47 = vld [vmem:[%s4395_s29 + $0xd0] ss:$8 sps:$4 sm:$0xff]   ;;  %vm1145_vm2 = vcmask 326656   ;;  %vm4257_vm3 = vmmov 0  }
  0x27   : > { %v3809_v48 = vld [vmem:[%s5557_s3 + $0x11c] ss:$8 sps:$4 sm:$0xff]   ;;  %v3811_v49 = vld [vmem:[%s5557_s3 + $0x118] ss:$8 sps:$4 sm:$0xff]   ;;  %v3812_v50 = vld [vmem:[%s5557_s3 + $0x10c] ss:$8 sps:$4 sm:$0xff]  }
  0x28   : > { %729 = vmatpush1.bf16.msra.mxu0 %v3751_v10  ;;  %1168 = vmatprep.subr.bf16.mxu1 %v3809_v48  ;;  %v3814_v51 = vld [vmem:[%s5557_s3 + $0x108] ss:$8 sps:$4 sm:$0xff]   ;;  %v3815_v52 = vld [vmem:[%s5557_s3 + $0xfc] ss:$8 sps:$4 sm:$0xff]   ;;  %v3817_v53 = vld [vmem:[%s5557_s3 + $0xf8] ss:$8 sps:$4 sm:$0xff]  }
  0x29   : > { %730 = vmatprep.subr.bf16.mxu0 %v3752_v11  ;;  %1169 = vmatpush1.bf16.msra.mxu1 %v3811_v49  ;;  %v3820_v54 = vld [vmem:[%s5557_s3 + $0x26c] ss:$8 sps:$4 sm:$0xff]   ;;  %v3818_v55 = vld [vmem:[%s5557_s3 + $0x268] ss:$8 sps:$4 sm:$0xff]   ;;  %v3826_v58 = vld [vmem:[%s5557_s3 + $0x25c] ss:$8 sps:$4 sm:$0xff]  }
  0x2a   : > { %1170 = vmatprep.subr.bf16.mxu1 %v3812_v50  ;;  %v3821_v56 = vld [vmem:[%s5557_s3 + $0xec] ss:$8 sps:$4 sm:$0xff]   ;;  %v3823_v57 = vld [vmem:[%s5557_s3 + $0xe8] ss:$8 sps:$4 sm:$0xff]   ;;  %v3824_v59 = vld [vmem:[%s5557_s3 + $0x258] ss:$8 sps:$4 sm:$0xff]  }
  0x2b   : > { %v3827_v60 = vld [vmem:[%s5557_s3 + $0xdc] ss:$8 sps:$4 sm:$0xff]   ;;  %v3829_v61 = vld [vmem:[%s5557_s3 + $0xd8] ss:$8 sps:$4 sm:$0xff]   ;;  %v3832_v62 = vld [vmem:[%s5557_s3 + $0x24c] ss:$8 sps:$4 sm:$0xff]  }
  0x2c   : > { %731 = vmatpush1.bf16.msra.mxu0 %v3754_v12  ;;  %v3830_v63 = vld [vmem:[%s5557_s3 + $0x248] ss:$8 sps:$4 sm:$0xff]   ;;  %v3833_v0 = vld [vmem:[%s5557_s3 + $0xcc] ss:$8 sps:$4 sm:$0xff]   ;;  %v3838_v2 = vld [vmem:[%s5557_s3 + $0x23c] ss:$8 sps:$4 sm:$0xff]  }
  0x2d   : > { %732 = vmatprep.subr.bf16.mxu0 %v3755_v13  ;;  %1171 = vmatpush1.bf16.msra.mxu1 %v3814_v51  ;;  %v3835_v1 = vld [vmem:[%s5557_s3 + $0xc8] ss:$8 sps:$4 sm:$0xff]   ;;  %v3836_v3 = vld [vmem:[%s5557_s3 + $0x238] ss:$8 sps:$4 sm:$0xff]   ;;  %v3839_v4 = vld [vmem:[%s5557_s3 + $0xbc] ss:$8 sps:$4 sm:$0xff]  }
  0x2e   : > { %1172 = vmatprep.subr.bf16.mxu1 %v3815_v52  ;;  %v3841_v5 = vld [vmem:[%s5557_s3 + $0xb8] ss:$8 sps:$4 sm:$0xff]   ;;  %v3844_v6 = vld [vmem:[%s5557_s3 + $0x22c] ss:$8 sps:$4 sm:$0xff]   ;;  %v3842_v7 = vld [vmem:[%s5557_s3 + $0x228] ss:$8 sps:$4 sm:$0xff]  }
  0x2f   : > { %v3845_v8 = vld [vmem:[%s5557_s3 + $0xac] ss:$8 sps:$4 sm:$0xff]   ;;  %v3847_v9 = vld [vmem:[%s5557_s3 + $0xa8] ss:$8 sps:$4 sm:$0xff]   ;;  %v3850_v10 = vld [vmem:[%s5557_s3 + $0x21c] ss:$8 sps:$4 sm:$0xff]  }
  0x30   : > { %733 = vmatpush1.bf16.msra.mxu0 %v3757_v14  ;;  %v3848_v11 = vld [vmem:[%s5557_s3 + $0x218] ss:$8 sps:$4 sm:$0xff]   ;;  %v3280_v12 = vld [vmem:[%s5557_s3 + $0x148] sm:$0xff]  ;;  %vm2957_vm4 = vcmask 982016   ;;  %vm3064_vm5 = vcmask 1041408   ;;  %vm3060_vm6 = vcmask 687104  }
  0x31   : > { %734 = vmatprep.subr.bf16.mxu0 %v3758_v15  ;;  %1173 = vmatpush1.bf16.msra.mxu1 %v3817_v53  ;;  %v3302_v13 = vcombine.high %v3280_v12, %v3280_v12  ;;  %v3301_v14 = vcombine.low %v3280_v12, %v3280_v12  ;;  %v3855_v15 = vld [vmem:[%s5557_s3 + $0x20c] ss:$8 sps:$4 sm:$0xff]   ;;  %s3195_s29 = sshll.u32 %s380_s13, 3  ;;  %s3639_s12 = sshll.u32 %s4340_s21, 7 }
  0x32   : > { %1174 = vmatprep.subr.bf16.mxu1 %v3821_v56  ;;  %s382_s14 = scalar_lea.vmem [#allocation2], %s3195_s29  ;;  %s3130_s16 = scalar_lea.hbm %s5565_s11, %s3639_s12 }
  0x33   : > { %s3132_s15 = sshll.u32 %s382_s14, 4  ;;  %s4197_s0 = sshll.u32 %s4258_s30, 4  ;;  %s3133_s15 = int_to_ptr.vmem [resolvable:$true] %s3132_s15  ;;  %s4198_s0 = int_to_ptr.vmem [resolvable:$false] %s4197_s0 }
  0x34   : > { %735 = vmatpush1.bf16.msra.mxu0 %v3760_v16  ;;  %v1163_v16 = vsel %vm1161_vm1, %v3301_v14, 0  ;;  %s4193_s25 = scalar_lea.vmem %s3133_s15, 128  ;;  %s4199_s21 = scalar_lea.vmem %s4198_s0, 256 }
  0x35   : > { %748 = vmatprep.subr.bf16.mxu0 %v3761_v17  ;;  %1175 = vmatpush1.bf16.msra.mxu1 %v3823_v57  ;;  %v3853_v17 = vld [vmem:[%s5557_s3 + $0x208] ss:$8 sps:$4 sm:$0xff]   ;;  %p4194_p11 = scmp.ne.s32.totalorder %s3133_s15, %s4193_s25  ;;  %p4200_p0 = scmp.lt.s32.totalorder %s3133_s15, %s4198_s0 }
  0x36   : > { %1176 = vmatprep.subr.bf16.mxu1 %v3827_v60  ;;  %p4201_p1 = scmp.lt.s32.totalorder %s4199_s21, %s4193_s25 }
  0x37   : > { %p4195_p12 = pnand %p4194_p11, %p4357_p5 }
  0x38   : > { %749 = vmatpush2.bf16.msra.mxu0 %v3763_v18  ;;  %v3856_v18 = vld [vmem:[%s5557_s3 + $0x13c] ss:$8 sps:$4 sm:$0xff]   ;;  %p4202_p2 = por %p4201_p1, %p4200_p0 }
  0x39   : > { %750 = vmatprep.subr.bf16.mxu0 %v3764_v19  ;;  %1177 = vmatpush1.bf16.msra.mxu1 %v3829_v61  ;;  %v3858_v19 = vld [vmem:[%s5557_s3 + $0x138] ss:$8 sps:$4 sm:$0xff]   ;;  %p4196_p13 = pneg %p4195_p12 }
  0x3a   : > { %1178 = vmatprep.subr.bf16.mxu1 %v3833_v0  ;;  %v439_v61 = vld [vmem:[%s5556_s2] sm:$0x3] }
  0x3b   : > { %p4203_p3 = pnand %p4202_p2, %p4196_p13 }
  0x3c   : > { %751 = vmatpush2.bf16.msra.mxu0 %v3766_v20  ;;  %v3861_v20 = vld [vmem:[%s5557_s3 + $0x1fc] ss:$8 sps:$4 sm:$0xff]  }
  0x3d   : > { %1839 = vmatprep.subr.bf16.mxu0 %v3820_v54  ;;  %1179 = vmatpush1.bf16.msra.mxu1 %v3835_v1  ;;  %v441_v54 = vlaneseq }
  0x3e   : > { %1180 = vmatprep.subr.bf16.mxu1 %v3839_v4 }
  0x3f   : > { %753 = vmatmul.mubr.bf16.vlgmr.msra.gmra.mxu0 %v3767_v21  ;;  %v3859_v21 = vld [vmem:[%s5557_s3 + $0x1f8] ss:$8 sps:$4 sm:$0xff]   ;;  %v4632_v57 = vshrl.u32 %v441_v54, 7 }
  0x40   : > { %3247 = vmatprep.mubr.msk.bf16.mxu0 %vm677_vm0, %v3770_v22  ;;  %1840 = vmatpush1.bf16.msra.mxu0 %v3818_v55  ;;  %v3862_v22 = vld [vmem:[%s5557_s3 + $0x12c] ss:$8 sps:$4 sm:$0xff]  }
  0x41   : > { %1841 = vmatprep.subr.bf16.mxu0 %v3826_v58  ;;  %1181 = vmatpush1.bf16.msra.mxu1 %v3841_v5 }
  0x42   : > { %1182 = vmatprep.subr.bf16.mxu1 %v3845_v8 }
  0x44   : > { %1842 = vmatpush1.bf16.msra.mxu0 %v3824_v59  ;;  %v447_v59 = vsub.s32 1, %v4632_v57 }
  0x45   : > { %1843 = vmatprep.subr.bf16.mxu0 %v3832_v62  ;;  %1183 = vmatpush1.bf16.msra.mxu1 %v3847_v9  ;;  %v443_v62 = vsub.s32 0, %v4632_v57 }
  0x46   : > { %3303 = vmatprep.subr.msk.bf16.mxu1 %vm1161_vm1, %v3302_v13  ;;  %v4647_v0 = vrot.slane %v439_v61, %v447_v59 }
  0x47   : > { %763 = vmatmul.mubr.bf16.gmra.mxu0 %v3772_v23  ;;  %v3406_v23 = vld [vmem:[%s5557_s3 + $0x298] sm:$0xff] }
  0x48   : > { %3248 = vmatprep.mubr.msk.bf16.mxu0 %vm677_vm0, %v3773_v24  ;;  %1844 = vmatpush1.bf16.msra.mxu0 %v3830_v63  ;;  %v3864_v24 = vld [vmem:[%s5557_s3 + $0x128] ss:$8 sps:$4 sm:$0xff]  }
  0x49   : > { %1845 = vmatprep.subr.bf16.mxu0 %v3838_v2  ;;  %1195 = vmatpush2.bf16.msra.mxu1 %v1163_v16  ;;  %v4653_v2 = vrot.slane %v439_v61, %v443_v62 }
  0x4a   : > { %1196 = vmatprep.subr.bf16.mxu1 %v3856_v18 }
  0x4c   : > { %1846 = vmatpush1.bf16.msra.mxu0 %v3836_v3 }
  0x4d   : > { %1847 = vmatprep.subr.bf16.mxu0 %v3844_v6  ;;  %1197 = vmatpush2.bf16.msra.mxu1 %v3858_v19 }
  0x4e   : > { %1198 = vmatprep.subr.bf16.mxu1 %v3862_v22 }
  0x4f   : > { %773 = vmatmul.mubr.bf16.gmra.mxu0 %v3775_v25  ;;  %v3428_v25 = vcombine.high %v3406_v23, %v3406_v23 }
  0x50   : > { %3249 = vmatprep.mubr.msk.bf16.mxu0 %vm677_vm0, %v3776_v26  ;;  %1848 = vmatpush1.bf16.msra.mxu0 %v3842_v7  ;;  %v3427_v26 = vcombine.low %v3406_v23, %v3406_v23 }
  0x51   : > { %1849 = vmatprep.subr.bf16.mxu0 %v3850_v10  ;;  %1199 = vmatpush2.bf16.msra.mxu1 %v3864_v24 }
  0x54   : > { %1850 = vmatpush1.bf16.msra.mxu0 %v3848_v11 }
  0x55   : > { %1851 = vmatprep.subr.bf16.mxu0 %v3855_v15 }
  0x57   : > { %783 = vmatmul.mubr.bf16.gmra.mxu0 %v3778_v27  ;;  %v1834_v27 = vsel %vm1161_vm1, %v3427_v26, 0 }
  0x58   : > { %3250 = vmatprep.mubr.msk.bf16.mxu0 %vm677_vm0, %v3779_v28  ;;  %1852 = vmatpush1.bf16.msra.mxu0 %v3853_v17  ;;  %v3869_v28 = vld [vmem:[%s5557_s3 + $0x74] ss:$8 sps:$4 sm:$0xff]  }
  0x59   : > { %1853 = vmatprep.subr.bf16.mxu0 %v3861_v20  ;;  %1377 = vmatprep.subr.bf16.mxu1 %v3869_v28 }
  0x5c   : > { %1854 = vmatpush1.bf16.msra.mxu0 %v3859_v21 }
  0x5d   : > { %3429 = vmatprep.subr.msk.bf16.mxu0 %vm1161_vm1, %v3428_v25 }
  0x5f   : > { %793 = vmatmul.mubr.bf16.gmra.mxu0 %v3781_v29  ;;  %v3872_v29 = vld [vmem:[%s5557_s3 + $0x28c] ss:$8 sps:$4 sm:$0xff]  }
  0x60   : > { %3251 = vmatprep.mubr.msk.bf16.mxu0 %vm677_vm0, %v3782_v30  ;;  %1866 = vmatpush2.bf16.msra.mxu0 %v1834_v27  ;;  %v3870_v30 = vld [vmem:[%s5557_s3 + $0x288] ss:$8 sps:$4 sm:$0xff]  }
  0x61   : > { %1867 = vmatprep.subr.bf16.mxu0 %v3872_v29 }
  0x64   : > { %1868 = vmatpush2.bf16.msra.mxu0 %v3870_v30 }
  0x67   : > { %803 = vmatmul.mubr.bf16.gmra.mxu0 %v3784_v31  ;;  %v3878_v31 = vld [vmem:[%s5557_s3 + $0x27c] ss:$8 sps:$4 sm:$0xff]  }
  0x68   : > { %3252 = vmatprep.mubr.msk.bf16.mxu0 %vm677_vm0, %v3785_v32  ;;  %v3876_v32 = vld [vmem:[%s5557_s3 + $0x278] ss:$8 sps:$4 sm:$0xff]   ;;  %1869 = vmatprep.subr.bf16.mxu0 %v3878_v31 }
  0x69   : > { %1870 = vmatpush2.bf16.msra.mxu0 %v3876_v32 }
  0x6f   : > { %813 = vmatmul.mubr.bf16.gmra.mxu0 %v3787_v33 }
  0x70   : > { %3253 = vmatprep.mubr.msk.bf16.mxu0 %vm677_vm0, %v3788_v34 }
  0x77   : > { %823 = vmatmul.mubr.bf16.gmra.mxu0 %v3790_v35 }
  0x78   : > { %3254 = vmatprep.mubr.msk.bf16.mxu0 %vm677_vm0, %v3791_v36 }
  0x7f   : > { %833 = vmatmul.mubr.bf16.gmra.mxu0 %v3793_v37 }
  0x80   : > { %3255 = vmatprep.mubr.msk.bf16.mxu0 %vm677_vm0, %v3794_v38 }
  0x87   : > { %843 = vmatmul.mubr.bf16.gmra.mxu0 %v3796_v39 }
  0x88   : > { %3256 = vmatprep.mubr.msk.bf16.mxu0 %vm677_vm0, %v3797_v40 }
  0x8f   : > { %853 = vmatmul.mubr.bf16.gmra.mxu0 %v3799_v41 }
  0x90   : > { %3257 = vmatprep.mubr.msk.bf16.mxu0 %vm677_vm0, %v3800_v42 }
  0x97   : > { %863 = vmatmul.mubr.bf16.gmra.mxu0 %v3802_v43 }
  0x98   : > { %3258 = vmatprep.mubr.msk.bf16.mxu0 %vm677_vm0, %v3803_v44 }
  0x9f   : > { %873 = vmatmul.mubr.bf16.gmra.mxu0 %v3805_v45 }
  0xa0   : > { %3259 = vmatprep.mubr.msk.bf16.mxu0 %vm677_vm0, %v3806_v46 }
  0xa7   : > { %883 = vmatmul.mubr.bf16.gmra.mxu0 %v3808_v47 }
  0xff   : > { %v4608_v33 = vpop.f32.mrf.mxu0 }
 0x101   : > { %v756_v34 = vpop.f32.mrf.mxu0 }
 0x102   : > { %v757_v4 = vadd.f32 %v756_v34, %v4647_v0 }
 0x103   : > { %v758_v35 = vpop.f32.mrf.mxu0 }
 0x104   : > { %v759_v5 = vadd.f32 %v758_v35, %v4653_v2  ;;  %4033 = vtanh.f32 %v757_v4 }
 0x105   : > { %v760_v36 = vpop.f32.mrf.mxu0 }
 0x106   : > { %v761_v7 = vadd.f32 %v760_v36, %v4647_v0  ;;  %4035 = vtanh.f32 %v759_v5 }
 0x107   : > { %v764_v37 = vpop.f32.mrf.mxu0 }
 0x108   : > { %v765_v8 = vadd.f32 %v764_v37, %v4653_v2  ;;  %4037 = vtanh.f32 %v761_v7 }
 0x109   : > { %v766_v38 = vpop.f32.mrf.mxu0 }
 0x10a   : > { %v767_v10 = vadd.f32 %v766_v38, %v4647_v0  ;;  %4039 = vtanh.f32 %v765_v8 }
 0x10b   : > { %v768_v39 = vpop.f32.mrf.mxu0 }
 0x10c   : > { %v769_v11 = vadd.f32 %v768_v39, %v4653_v2  ;;  %4041 = vtanh.f32 %v767_v10 }
 0x10d   : > { %v770_v40 = vpop.f32.mrf.mxu0 }
 0x10e   : > { %v771_v13 = vadd.f32 %v770_v40, %v4647_v0  ;;  %4043 = vtanh.f32 %v769_v11 }
 0x10f   : > { %v774_v41 = vpop.f32.mrf.mxu0 }
 0x110   : > { %4045 = vtanh.f32 %v771_v13  ;;  %v775_v19 = vadd.f32 %v774_v41, %v4653_v2 }
 0x111   : > { %v776_v42 = vpop.f32.mrf.mxu0  ;;  %v4677_v28 = vpop.eup %4033 }
 0x112   : > { %v777_v21 = vadd.f32 %v776_v42, %v4647_v0 }
 0x113   : > { %v778_v43 = vpop.f32.mrf.mxu0  ;;  %v4036_v31 = vpop.eup %4035 }
 0x114   : > { %v779_v23 = vadd.f32 %v778_v43, %v4653_v2 }
 0x115   : > { %v780_v44 = vpop.f32.mrf.mxu0  ;;  %v4038_v34 = vpop.eup %4037 }
 0x116   : > { %v781_v25 = vadd.f32 %v780_v44, %v4647_v0 }
 0x117   : > { %v4610_v45 = vpop.f32.mrf.mxu0  ;;  %v4040_v37 = vpop.eup %4039 }
 0x118   : > { %v785_v35 = vadd.f32 %v4610_v45, %v4653_v2 }
 0x119   : > { %v4612_v46 = vpop.f32.mrf.mxu0  ;;  %v4042_v40 = vpop.eup %4041 }
 0x11a   : > { %v787_v38 = vadd.f32 %v4612_v46, %v4647_v0 }
 0x11b   : > { %v4614_v47 = vpop.f32.mrf.mxu0  ;;  %v4688_v43 = vpop.eup %4043 }
 0x11c   : > { %v789_v41 = vadd.f32 %v4614_v47, %v4653_v2 }
 0x11d   : > { %v4616_v48 = vpop.f32.mrf.mxu0  ;;  %v4692_v45 = vpop.eup %4045 }
 0x11e   : > { %v791_v44 = vadd.f32 %v4616_v48, %v4647_v0 }
 0x11f   : > { %v4618_v49 = vpop.f32.mrf.mxu0 }
 0x120   : > { %v795_v48 = vadd.f32 %v4618_v49, %v4653_v2 }
 0x121   : > { %v4620_v50 = vpop.f32.mrf.mxu0 }
 0x122   : > { %v797_v11 = vadd.f32 %v4620_v50, %v4647_v0 }
 0x123   : > { %v4622_v51 = vpop.f32.mrf.mxu0 }
 0x125   : > { %v4624_v52 = vpop.f32.mrf.mxu0 }
 0x127   : > { %v4626_v53 = vpop.f32.mrf.mxu0 }
 0x129   : > { %v4628_v55 = vpop.f32.mrf.mxu0 }
 0x12b   : > { %v4630_v56 = vpop.f32.mrf.mxu0 }
 0x12d   : > { %v4634_v58 = vpop.f32.mrf.mxu0 }
 0x12f   : > { %v4637_v60 = vpop.f32.mrf.mxu0 }
 0x131   : > { %v4643_v63 = vpop.f32.mrf.mxu0 }
 0x133   : > { %v4649_v1 = vpop.f32.mrf.mxu0 }
 0x135   : > { %v4655_v3 = vpop.f32.mrf.mxu0 }
 0x137   : > { %v4659_v6 = vpop.f32.mrf.mxu0 }
 0x139   : > { %v4663_v9 = vpop.f32.mrf.mxu0 }
 0x13b   : > { %v828_v12 = vpop.f32.mrf.mxu0 }
 0x13c   : > { %v829_v16 = vadd.f32 %v828_v12, %v4653_v2 }
 0x13d   : > { %v830_v14 = vpop.f32.mrf.mxu0 }
 0x13e   : > { %v831_v15 = vadd.f32 %v830_v14, %v4647_v0 }
 0x13f   : > { %v834_v17 = vpop.f32.mrf.mxu0 }
 0x140   : > { %v835_v18 = vadd.f32 %v834_v17, %v4653_v2  ;;  %4047 = vtanh.f32 %v831_v15 }
 0x141   : > { %v836_v20 = vpop.f32.mrf.mxu0 }
 0x142   : > { %4049 = vtanh.f32 %v835_v18  ;;  %v837_v22 = vadd.f32 %v836_v20, %v4647_v0 }
 0x143   : > { %4051 = vtanh.f32 %v829_v16  ;;  %v838_v24 = vpop.f32.mrf.mxu0 }
 0x144   : > { %4053 = vtanh.f32 %v837_v22  ;;  %v839_v29 = vadd.f32 %v838_v24, %v4653_v2 }
 0x145   : > { %4055 = vtanh.f32 %v775_v19  ;;  %v840_v26 = vpop.f32.mrf.mxu0  ;;  %v799_v19 = vadd.f32 %v4622_v51, %v4653_v2 }
 0x146   : > { %4057 = vtanh.f32 %v777_v21  ;;  %v841_v27 = vadd.f32 %v840_v26, %v4647_v0  ;;  %v801_v21 = vadd.f32 %v4624_v52, %v4647_v0  ;;  %v3875_v26 = vld [vmem:[%s5557_s3 + $0x64] ss:$8 sps:$4 sm:$0xff]  }
 0x147   : > { %4059 = vtanh.f32 %v779_v23  ;;  %v844_v30 = vpop.f32.mrf.mxu0  ;;  %v3867_v23 = vld [vmem:[%s5557_s3 + $0x70] ss:$8 sps:$4 sm:$0xff]  }
 0x148   : > { %4061 = vtanh.f32 %v781_v25  ;;  %v845_v32 = vadd.f32 %v844_v30, %v4653_v2 }
 0x149   : > { %4063 = vtanh.f32 %v841_v27  ;;  %v846_v36 = vpop.f32.mrf.mxu0 }
 0x14a   : > { %4065 = vtanh.f32 %v845_v32  ;;  %v847_v39 = vadd.f32 %v846_v36, %v4647_v0 }
 0x14b   : > { %4067 = vtanh.f32 %v839_v29  ;;  %v848_v42 = vpop.f32.mrf.mxu0 }
 0x14c   : > { %4069 = vtanh.f32 %v847_v39  ;;  %v849_v47 = vadd.f32 %v848_v42, %v4653_v2 }
 0x14d   : > { %4071 = vtanh.f32 %v785_v35  ;;  %v850_v54 = vpop.f32.mrf.mxu0  ;;  %v4048_v46 = vpop.eup %4047  ;;  %v3873_v35 = vld [vmem:[%s5557_s3 + $0x60] ss:$8 sps:$4 sm:$0xff]  }
 0x14e   : > { %4073 = vtanh.f32 %v787_v38  ;;  %v851_v61 = vadd.f32 %v850_v54, %v4647_v0  ;;  %v4704_v16 = vadd.f32 %v4048_v46, %v4038_v34  ;;  %v807_v38 = vadd.f32 %v4628_v55, %v4647_v0 }
 0x14f   : > { %v4050_v4 = vpop.eup %4049  ;;  %4075 = vtanh.f32 %v789_v41  ;;  %v854_v5 = vpop.f32.mrf.mxu0  ;;  %v809_v55 = vadd.f32 %v4630_v56, %v4653_v2 }
 0x150   : > { %v4052_v7 = vpop.eup %4051  ;;  %4077 = vtanh.f32 %v791_v44  ;;  %v855_v8 = vadd.f32 %v854_v5, %v4653_v2  ;;  %v4701_v13 = vadd.f32 %v4050_v4, %v4040_v37  ;;  %v805_v37 = vadd.f32 %v4626_v53, %v4653_v2 }
 0x151   : > { %v4054_v10 = vpop.eup %4053  ;;  %4079 = vtanh.f32 %v851_v61  ;;  %v856_v12 = vpop.f32.mrf.mxu0  ;;  %v4710_v50 = vadd.f32 %v4052_v7, %v4036_v31  ;;  %v3879_v7 = vld [vmem:[%s5557_s3 + $0x50] ss:$8 sps:$4 sm:$0xff]  }
 0x152   : > { %v4056_v14 = vpop.eup %4055  ;;  %4081 = vtanh.f32 %v855_v8  ;;  %v857_v15 = vadd.f32 %v856_v12, %v4647_v0  ;;  %v4706_v17 = vadd.f32 %v4054_v10, %v4042_v40  ;;  %v3881_v40 = vld [vmem:[%s5557_s3 + $0x54] ss:$8 sps:$4 sm:$0xff]  }
 0x153   : > { %v4058_v18 = vpop.eup %4057  ;;  %4083 = vtanh.f32 %v849_v47  ;;  %v858_v49 = vpop.f32.mrf.mxu0  ;;  %v1030_v25 = vpack.c.bf16 %v4701_v13, %v4710_v50 }
 0x154   : > { %v4712_v20 = vpop.eup %4059  ;;  %4085 = vtanh.f32 %v857_v15  ;;  %v1031_v22 = vpack.c.bf16 %v4706_v17, %v4704_v16  ;;  %v859_v30 = vadd.f32 %v858_v49, %v4653_v2 }
 0x155   : > { %v4721_v24 = vpop.eup %4061  ;;  %4087 = vtanh.f32 %v795_v48  ;;  %v860_v51 = vpop.f32.mrf.mxu0 }
 0x156   : > { %v4064_v52 = vpop.eup %4063  ;;  %4089 = vtanh.f32 %v797_v11  ;;  %v861_v27 = vadd.f32 %v860_v51, %v4647_v0  ;;  %3304 = vmatprep.mubr.msk.bf16.mxu1 %vm1145_vm2, %v1031_v22 }
 0x157   : > { %v4066_v29 = vpop.eup %4065  ;;  %4091 = vtanh.f32 %v799_v19  ;;  %v864_v31 = vpop.f32.mrf.mxu0  ;;  %1201 = vmatmul.mubr.bf16.vlgmr.msra.gmra.mxu1 %v1030_v25  ;;  %v4745_v44 = vadd.f32 %v4064_v52, %v4692_v45  ;;  %v827_v45 = vadd.f32 %v4663_v9, %v4647_v0  ;;  %v3884_v9 = vld [vmem:[%s5557_s3 + $0x44] ss:$8 sps:$4 sm:$0xff]   ;;  %v3882_v19 = vld [vmem:[%s5557_s3 + $0x40] ss:$8 sps:$4 sm:$0xff]  }
 0x158   : > { %v4068_v32 = vpop.eup %4067  ;;  %4093 = vtanh.f32 %v801_v21  ;;  %v865_v34 = vadd.f32 %v864_v31, %v4653_v2  ;;  %1378 = vmatpush1.bf16.msra.mxu1 %v3867_v23  ;;  %v4742_v41 = vadd.f32 %v4066_v29, %v4056_v14  ;;  %v811_v21 = vadd.f32 %v4634_v58, %v4647_v0  ;;  %v3887_v23 = vld [vmem:[%s5557_s3 + $0x34] ss:$8 sps:$4 sm:$0xff]  }
 0x159   : > { %v4070_v36 = vpop.eup %4069  ;;  %4095 = vtanh.f32 %v861_v27  ;;  %v866_v39 = vpop.f32.mrf.mxu0  ;;  %1379 = vmatprep.subr.bf16.mxu1 %v3875_v26  ;;  %v4753_v4 = vadd.f32 %v4068_v32, %v4688_v43  ;;  %v815_v58 = vadd.f32 %v4637_v60, %v4653_v2  ;;  %v817_v60 = vadd.f32 %v4643_v63, %v4647_v0 }
 0x15a   : > { %v4072_v42 = vpop.eup %4071  ;;  %4097 = vtanh.f32 %v865_v34  ;;  %v867_v54 = vadd.f32 %v866_v39, %v4647_v0  ;;  %v4748_v53 = vadd.f32 %v4070_v36, %v4058_v18  ;;  %v819_v63 = vadd.f32 %v4649_v1, %v4653_v2  ;;  %v3893_v1 = vld [vmem:[%s5557_s3 + $0x14] ss:$8 sps:$4 sm:$0xff]  }
 0x15b   : > { %v4074_v46 = vpop.eup %4073  ;;  %4099 = vtanh.f32 %v859_v30  ;;  %v868_v61 = vpop.f32.mrf.mxu0  ;;  %v1032_v43 = vpack.c.bf16 %v4742_v41, %v4753_v4 }
 0x15c   : > { %v4755_v47 = vpop.eup %4075  ;;  %4101 = vtanh.f32 %v867_v54  ;;  %1380 = vmatpush1.bf16.msra.mxu1 %v3873_v35  ;;  %v1033_v5 = vpack.c.bf16 %v4748_v53, %v4745_v44  ;;  %v869_v12 = vadd.f32 %v868_v61, %v4653_v2  ;;  %v3885_v35 = vld [vmem:[%s5557_s3 + $0x30] ss:$8 sps:$4 sm:$0xff]   ;;  %v3888_v61 = vld [vmem:[%s5557_s3 + $0x20] ss:$8 sps:$4 sm:$0xff]  }
 0x15d   : > { %v4764_v56 = vpop.eup %4077  ;;  %4103 = vtanh.f32 %v805_v37  ;;  %v870_v8 = vpop.f32.mrf.mxu0  ;;  %1381 = vmatprep.subr.bf16.mxu1 %v3881_v40 }
 0x15e   : > { %v4080_v10 = vpop.eup %4079  ;;  %4105 = vtanh.f32 %v807_v38  ;;  %v871_v48 = vadd.f32 %v870_v8, %v4647_v0  ;;  %3305 = vmatprep.mubr.msk.bf16.mxu1 %vm1145_vm2, %v1033_v5  ;;  %3430 = vmatprep.mubr.msk.bf16.mxu0 %vm1145_vm2, %v1033_v5  ;;  %v3890_v38 = vld [vmem:[%s5557_s3 + $0x24] ss:$8 sps:$4 sm:$0xff]   ;;  %v821_v5 = vadd.f32 %v4655_v3, %v4647_v0  ;;  %v825_v3 = vadd.f32 %v4659_v6, %v4653_v2 }
 0x15f   : > { %v4082_v11 = vpop.eup %4081  ;;  %4107 = vtanh.f32 %v809_v55  ;;  %v874_v14 = vpop.f32.mrf.mxu0  ;;  %1211 = vmatmul.mubr.bf16.gmra.mxu1 %v1032_v43  ;;  %1872 = vmatmul.mubr.bf16.vlgmr.msra.gmra.mxu0 %v1032_v43  ;;  %v4788_v52 = vadd.f32 %v4080_v10, %v4721_v24  ;;  %v755_v6 = vadd.f32 %v4608_v33, %v4653_v2  ;;  %v997_v33 = vld [vmem:[%s5557_s3 + $0xa0] sm:$0xff] }
 0x160   : > { %v4084_v15 = vpop.eup %4083  ;;  %4109 = vtanh.f32 %v827_v45  ;;  %v875_v18 = vadd.f32 %v874_v14, %v4653_v2  ;;  %1382 = vmatpush1.bf16.msra.mxu1 %v3879_v7  ;;  %v4784_v51 = vadd.f32 %v4082_v11, %v4072_v42 }
 0x161   : > { %v4086_v49 = vpop.eup %4085  ;;  %4111 = vtanh.f32 %v871_v48  ;;  %v876_v22 = vpop.f32.mrf.mxu0  ;;  %1383 = vmatprep.subr.bf16.mxu1 %v3884_v9  ;;  %v4795_v31 = vadd.f32 %v4084_v15, %v4712_v20 }
 0x162   : > { %v4088_v25 = vpop.eup %4087  ;;  %4113 = vtanh.f32 %v875_v18  ;;  %v877_v26 = vadd.f32 %v876_v22, %v4647_v0  ;;  %v4790_v27 = vadd.f32 %v4086_v49, %v4074_v46  ;;  %v3896_v22 = vld [vmem:[%s5557_s3 + $0x4] ss:$8 sps:$4 sm:$0xff]  }
 0x163   : > { %v4090_v29 = vpop.eup %4089  ;;  %4115 = vtanh.f32 %v869_v12  ;;  %v878_v30 = vpop.f32.mrf.mxu0  ;;  %v1034_v37 = vpack.c.bf16 %v4784_v51, %v4795_v31 }
 0x164   : > { %v4797_v32 = vpop.eup %4091  ;;  %4117 = vtanh.f32 %v877_v26  ;;  %v879_v34 = vadd.f32 %v878_v30, %v4653_v2  ;;  %1384 = vmatpush1.bf16.msra.mxu1 %v3882_v19  ;;  %v1035_v24 = vpack.c.bf16 %v4790_v27, %v4788_v52  ;;  %v3891_v19 = vld [vmem:[%s5557_s3 + $0x10] ss:$8 sps:$4 sm:$0xff]  }
 0x165   : > { %v4805_v36 = vpop.eup %4093  ;;  %4119 = vtanh.f32 %v811_v21  ;;  %v880_v20 = vpop.f32.mrf.mxu0  ;;  %1385 = vmatprep.subr.bf16.mxu1 %v3887_v23 }
 0x166   : > { %v4096_v39 = vpop.eup %4095  ;;  %4121 = vtanh.f32 %v879_v34  ;;  %v881_v40 = vadd.f32 %v880_v20, %v4647_v0  ;;  %3306 = vmatprep.mubr.msk.bf16.mxu1 %vm1145_vm2, %v1035_v24  ;;  %3431 = vmatprep.mubr.msk.bf16.mxu0 %vm1145_vm2, %v1035_v24  ;;  %v3329_v34 = vcombine.low %v997_v33, %v997_v33 }
 0x167   : > { %v4098_v42 = vpop.eup %4097  ;;  %4123 = vtanh.f32 %v815_v58  ;;  %v884_v54 = vpop.f32.mrf.mxu0  ;;  %1221 = vmatmul.mubr.bf16.gmra.mxu1 %v1034_v37  ;;  %1882 = vmatmul.mubr.bf16.gmra.mxu0 %v1034_v37  ;;  %v4832_v10 = vadd.f32 %v4096_v39, %v4764_v56  ;;  %v3330_v58 = vcombine.high %v997_v33, %v997_v33  ;;  %v3905_v33 = vld [vmem:[%s5557_s3 + $0x1c0] ss:$8 sps:$4 sm:$0xff]  }
 0x168   : > { %v4100_v46 = vpop.eup %4099  ;;  %4125 = vtanh.f32 %v881_v40  ;;  %v885_v55 = vadd.f32 %v884_v54, %v4653_v2  ;;  %1386 = vmatpush1.bf16.msra.mxu1 %v3885_v35  ;;  %v4828_v8 = vadd.f32 %v4098_v42, %v4088_v25 }
 0x169   : > { %v4102_v45 = vpop.eup %4101  ;;  %4127 = vtanh.f32 %v817_v60  ;;  %v886_v7 = vpop.f32.mrf.mxu0  ;;  %1387 = vmatprep.subr.bf16.mxu1 %v3890_v38  ;;  %v4839_v14 = vadd.f32 %v4100_v46, %v4755_v47  ;;  %v3901_v46 = vld [vmem:[%s5557_s3 + $0x94] ss:$8 sps:$4 sm:$0xff]  }
 0x16a   : > { %v4104_v43 = vpop.eup %4103  ;;  %4129 = vtanh.f32 %v885_v55  ;;  %v887_v9 = vadd.f32 %v886_v7, %v4647_v0  ;;  %v4834_v48 = vadd.f32 %v4102_v45, %v4090_v29  ;;  %v3894_v29 = vld [vmem:[%s5557_s3] ss:$8 sps:$4 sm:$0xff]   ;;  %v3899_v7 = vld [vmem:[%s5557_s3 + $0x90] ss:$8 sps:$4 sm:$0xff]  }
 0x16b   : > { %v4106_v11 = vpop.eup %4105  ;;  %4131 = vtanh.f32 %v819_v63  ;;  %v888_v12 = vpop.f32.mrf.mxu0  ;;  %v1036_v47 = vpack.c.bf16 %v4828_v8, %v4839_v14 }
 0x16c   : > { %v4108_v15 = vpop.eup %4107  ;;  %4133 = vtanh.f32 %v887_v9  ;;  %v889_v18 = vadd.f32 %v888_v12, %v4653_v2  ;;  %1388 = vmatpush1.bf16.msra.mxu1 %v3888_v61  ;;  %v1037_v56 = vpack.c.bf16 %v4834_v48, %v4832_v10 }
 0x16d   : > { %v4110_v49 = vpop.eup %4109  ;;  %4135 = vtanh.f32 %v821_v5  ;;  %v890_v21 = vpop.f32.mrf.mxu0  ;;  %1389 = vmatprep.subr.bf16.mxu1 %v3893_v1 }
 0x16e   : > { %v4112_v23 = vpop.eup %4111  ;;  %4137 = vtanh.f32 %v889_v18  ;;  %v891_v25 = vadd.f32 %v890_v21, %v4647_v0  ;;  %3307 = vmatprep.mubr.msk.bf16.mxu1 %vm1145_vm2, %v1037_v56  ;;  %3432 = vmatprep.mubr.msk.bf16.mxu0 %vm1145_vm2, %v1037_v56  ;;  %v950_v39 = vadd.f32 %v4110_v49, %v4677_v28  ;;  %v3902_v18 = vld [vmem:[%s5557_s3 + $0x80] ss:$8 sps:$4 sm:$0xff]   ;;  %v3907_v21 = vld [vmem:[%s5557_s3 + $0x1c4] ss:$8 sps:$4 sm:$0xff]  }
 0x16f   : > { %v4114_v2 = vpop.eup %4113  ;;  %4139 = vtanh.f32 %v825_v3  ;;  %1231 = vmatmul.mubr.bf16.gmra.mxu1 %v1036_v47  ;;  %1892 = vmatmul.mubr.bf16.gmra.mxu0 %v1036_v47  ;;  %v4864_v35 = vadd.f32 %v4112_v23, %v4805_v36  ;;  %v1372_v36 = vsel %vm1161_vm1, %v3329_v34, 0  ;;  %v4938_v34 = vpack.c.bf16 %v4788_v52, %v4748_v53  ;;  %v3917_v53 = vld [vmem:[%s5557_s3 + $0x180] ss:$8 sps:$4 sm:$0xff]   ;;  %v3922_v52 = vld [vmem:[%s5557_s3 + $0x174] ss:$8 sps:$4 sm:$0xff]  }
 0x170   : > { %v4116_v26 = vpop.eup %4115  ;;  %4141 = vtanh.f32 %v891_v25  ;;  %1390 = vmatpush1.bf16.msra.mxu1 %v3891_v19  ;;  %v969_v30 = vadd.f32 %v4114_v2, %v4104_v43  ;;  %v999_v55 = vpack.c.bf16 %v4704_v16, %v950_v39  ;;  %v3904_v43 = vld [vmem:[%s5557_s3 + $0x84] ss:$8 sps:$4 sm:$0xff]   ;;  %v3357_v39 = vld [vmem:[%s5557_s3 + $0x1f0] sm:$0xff] }
 0x171   : > { %v4118_v0 = vpop.eup %4117  ;;  %4143 = vtanh.f32 %v755_v6  ;;  %1391 = vmatprep.subr.bf16.mxu1 %v3896_v22  ;;  %v4867_v37 = vadd.f32 %v4116_v26, %v4797_v32 }
 0x172   : > { %v4120_v24 = vpop.eup %4119  ;;  %v970_v60 = vadd.f32 %v4118_v0, %v4106_v11  ;;  %v1001_v0 = vpack.c.bf16 %v4745_v44, %v4706_v17  ;;  %v1000_v17 = vpack.c.bf16 %v4753_v4, %v4701_v13  ;;  %v3916_v44 = vld [vmem:[%s5557_s3 + $0x194] ss:$8 sps:$4 sm:$0xff]   ;;  %v3919_v13 = vld [vmem:[%s5557_s3 + $0x184] ss:$8 sps:$4 sm:$0xff]   ;;  %v4953_v4 = vpack.c.bf16 %v4795_v31, %v4742_v41  ;;  %v3920_v41 = vld [vmem:[%s5557_s3 + $0x170] ss:$8 sps:$4 sm:$0xff]  }
 0x173   : > { %v4122_v20 = vpop.eup %4121  ;;  %v1038_v54 = vpack.c.bf16 %v969_v30, %v4867_v37  ;;  %v3925_v31 = vld [vmem:[%s5557_s3 + $0x164] ss:$8 sps:$4 sm:$0xff]  }
 0x174   : > { %v4124_v38 = vpop.eup %4123  ;;  %1392 = vmatpush1.bf16.msra.mxu1 %v3894_v29  ;;  %v1039_v40 = vpack.c.bf16 %v970_v60, %v4864_v35  ;;  %v971_v42 = vadd.f32 %v4122_v20, %v4108_v15  ;;  %v3910_v29 = vld [vmem:[%s5557_s3 + $0x1b4] ss:$8 sps:$4 sm:$0xff]  }
 0x175   : > { %v4126_v63 = vpop.eup %4125  ;;  %3331 = vmatprep.subr.msk.bf16.mxu1 %vm1161_vm1, %v3330_v58  ;;  %v3908_v58 = vld [vmem:[%s5557_s3 + $0x1b0] ss:$8 sps:$4 sm:$0xff]   ;;  %v3928_v20 = vld [vmem:[%s5557_s3 + $0x154] ss:$8 sps:$4 sm:$0xff]  }
 0x176   : > { %v4128_v32 = vpop.eup %4127  ;;  %3308 = vmatprep.mubr.msk.bf16.mxu1 %vm1145_vm2, %v1039_v40  ;;  %3433 = vmatprep.mubr.msk.bf16.mxu0 %vm1145_vm2, %v1039_v40  ;;  %v972_v28 = vadd.f32 %v4126_v63, %v4120_v24  ;;  %v4880_v61 = vpack.c.bf16 %v971_v42, %v969_v30  ;;  %v3911_v30 = vld [vmem:[%s5557_s3 + $0x1a0] ss:$8 sps:$4 sm:$0xff]   ;;  %v3914_v24 = vld [vmem:[%s5557_s3 + $0x190] ss:$8 sps:$4 sm:$0xff]   ;;  %v3378_v40 = vcombine.low %v3357_v39, %v3357_v39 }
 0x177   : > { %v4130_v45 = vpop.eup %4129  ;;  %1241 = vmatmul.mubr.bf16.gmra.mxu1 %v1038_v54  ;;  %1902 = vmatmul.mubr.bf16.gmra.mxu0 %v1038_v54  ;;  %v3931_v63 = vld [vmem:[%s5557_s3 + $0x1e0] ss:$8 sps:$4 sm:$0xff]   ;;  %v3939_v54 = vld [vmem:[%s5557_s3 + $0x314] ss:$8 sps:$4 sm:$0xff]  }
 0x178   : > { %v4132_v5 = vpop.eup %4131  ;;  %1404 = vmatpush2.bf16.msra.mxu1 %v1372_v36  ;;  %3332 = vmatprep.mubr.msk.bf16.mxu1 %vm1145_vm2, %v999_v55  ;;  %v4886_v1 = vpack.c.bf16 %v972_v28, %v970_v60  ;;  %v4891_v9 = vadd.f32 %v4130_v45, %v4124_v38  ;;  %v4960_v60 = vpack.c.bf16 %v4832_v10, %v4790_v27  ;;  %v3923_v27 = vld [vmem:[%s5557_s3 + $0x160] ss:$8 sps:$4 sm:$0xff]   ;;  %v3937_v36 = vld [vmem:[%s5557_s3 + $0x310] ss:$8 sps:$4 sm:$0xff]   ;;  %v3945_v55 = vld [vmem:[%s5557_s3 + $0x2f4] ss:$8 sps:$4 sm:$0xff]  }
 0x179   : > { %v4134_v16 = vpop.eup %4133  ;;  %1405 = vmatprep.subr.bf16.mxu1 %v3901_v46  ;;  %v4976_v10 = vpack.c.bf16 %v4839_v14, %v4784_v51  ;;  %v4983_v38 = vpack.c.bf16 %v4864_v35, %v4834_v48  ;;  %v3926_v51 = vld [vmem:[%s5557_s3 + $0x150] ss:$8 sps:$4 sm:$0xff]   ;;  %v3379_v14 = vcombine.high %v3357_v39, %v3357_v39  ;;  %v4996_v48 = vpack.c.bf16 %v4867_v37, %v4828_v8  ;;  %v3936_v8 = vld [vmem:[%s5557_s3 + $0x1d4] ss:$8 sps:$4 sm:$0xff]   ;;  %v3942_v46 = vld [vmem:[%s5557_s3 + $0x304] ss:$8 sps:$4 sm:$0xff]  }
 0x17a   : > { %v4136_v11 = vpop.eup %4135  ;;  %v4893_v3 = vadd.f32 %v4134_v16, %v4128_v32  ;;  %v1723_v6 = vpack.c.bf16 %v4891_v9, %v971_v42  ;;  %v1593_v35 = vsel %vm1161_vm1, %v3378_v40, 0  ;;  %v3933_v42 = vld [vmem:[%s5557_s3 + $0x1e4] ss:$8 sps:$4 sm:$0xff]   ;;  %v3934_v37 = vld [vmem:[%s5557_s3 + $0x1d0] ss:$8 sps:$4 sm:$0xff]  }
 0x17b   : > { %v4138_v12 = vpop.eup %4137  ;;  %v3940_v32 = vld [vmem:[%s5557_s3 + $0x300] ss:$8 sps:$4 sm:$0xff]   ;;  %v3948_v45 = vld [vmem:[%s5557_s3 + $0x2e4] ss:$8 sps:$4 sm:$0xff]   ;;  %v3949_v16 = vld [vmem:[%s5557_s3 + $0x2d0] ss:$8 sps:$4 sm:$0xff]  }
 0x17c   : > { %v4140_v15 = vpop.eup %4139  ;;  %1406 = vmatpush2.bf16.msra.mxu1 %v3899_v7  ;;  %v1724_v56 = vpack.c.bf16 %v4893_v3, %v972_v28  ;;  %v4899_v19 = vadd.f32 %v4138_v12, %v4132_v5  ;;  %v3943_v28 = vld [vmem:[%s5557_s3 + $0x2f0] ss:$8 sps:$4 sm:$0xff]   ;;  %v3946_v5 = vld [vmem:[%s5557_s3 + $0x2e0] ss:$8 sps:$4 sm:$0xff]   ;;  %v3951_v7 = vld [vmem:[%s5557_s3 + $0x2d4] ss:$8 sps:$4 sm:$0xff]  }
 0x17d   : > { %v4142_v49 = vpop.eup %4141  ;;  %1407 = vmatprep.subr.bf16.mxu1 %v3904_v43  ;;  %v3954_v43 = vld [vmem:[%s5557_s3 + $0x2c4] ss:$8 sps:$4 sm:$0xff]   ;;  %v3957_v12 = vld [vmem:[%s5557_s3 + $0x2b4] ss:$8 sps:$4 sm:$0xff]  }
 0x17e   : > { %v4144_v47 = vpop.eup %4143  ;;  %3434 = vmatprep.mubr.msk.bf16.mxu0 %vm1145_vm2, %v1724_v56  ;;  %v4906_v22 = vadd.f32 %v4142_v49, %v4136_v11  ;;  %v1964_v23 = vpack.c.bf16 %v4899_v19, %v4891_v9  ;;  %v3952_v11 = vld [vmem:[%s5557_s3 + $0x2c0] ss:$8 sps:$4 sm:$0xff]  }
 0x17f   : > { %v949_v25 = vadd.f32 %v4144_v47, %v4140_v15  ;;  %1912 = vmatmul.mubr.bf16.gmra.mxu0 %v1723_v6  ;;  %v3955_v15 = vld [vmem:[%s5557_s3 + $0x2b0] ss:$8 sps:$4 sm:$0xff]   ;;  %v3455_v56 = vld [vmem:[%s5557_s3 + $0x340] sm:$0xff]  ;;  %v3972_v9 = vld [vmem:[%s5559_s5 + $0x28] sm:$0xff]  }
 0x180   : > { %1408 = vmatpush2.bf16.msra.mxu1 %v3902_v18  ;;  %v1965_v2 = vpack.c.bf16 %v4906_v22, %v4893_v3  ;;  %v3960_v18 = vld [vmem:[%s5557_s3 + $0x2a4] ss:$8 sps:$4 sm:$0xff]   ;;  %v3958_v49 = vld [vmem:[%s5557_s3 + $0x2a0] ss:$8 sps:$4 sm:$0xff]   ;;  %v3477_v6 = vcombine.high %v3455_v56, %v3455_v56 }
 0x181   : > { %v998_v26 = vpack.c.bf16 %v4710_v50, %v949_v25  ;;  %1598 = vmatprep.subr.bf16.mxu1 %v3907_v21  ;;  %v3913_v50 = vld [vmem:[%s5557_s3 + $0x1a4] ss:$8 sps:$4 sm:$0xff]   ;;  %v3476_v21 = vcombine.low %v3455_v56, %v3455_v56  ;;  %v3965_v25 = vld [vmem:[%s5557_s3 + $0x334] ss:$8 sps:$4 sm:$0xff]  }
 0x183   : > { %1410 = vmatmul.mubr.bf16.vlgmr.msra.gmra.mxu1 %v998_v26  ;;  %v2075_v47 = vsel %vm1161_vm1, %v3476_v21, 0  ;;  %v3968_v26 = vld [vmem:[%s5557_s3 + $0x324] ss:$8 sps:$4 sm:$0xff]  }
 0x184   : > { %3333 = vmatprep.mubr.msk.bf16.mxu1 %vm1145_vm2, %v1001_v0  ;;  %1599 = vmatpush1.bf16.msra.mxu1 %v3905_v33  ;;  %v3963_v33 = vld [vmem:[%s5557_s3 + $0x330] ss:$8 sps:$4 sm:$0xff]  }
 0x185   : > { %1600 = vmatprep.subr.bf16.mxu1 %v3910_v29  ;;  %v3966_v29 = vld [vmem:[%s5557_s3 + $0x320] ss:$8 sps:$4 sm:$0xff]  }
 0x188   : > { %1601 = vmatpush1.bf16.msra.mxu1 %v3908_v58  ;;  %v4255_v58 = vmov 0  }
 0x189   : > { %1602 = vmatprep.subr.bf16.mxu1 %v3913_v50  ;;  %2347 = vmatprep.subr.bf16.mxu0 %v4255_v58 }
 0x18b   : > { %1420 = vmatmul.mubr.bf16.gmra.mxu1 %v1000_v17 }
 0x18c   : > { %3334 = vmatprep.mubr.msk.bf16.mxu1 %vm1145_vm2, %v4938_v34  ;;  %1603 = vmatpush1.bf16.msra.mxu1 %v3911_v30 }
 0x18d   : > { %1604 = vmatprep.subr.bf16.mxu1 %v3916_v44  ;;  %v3976_v44 = vld [vmem:[%s5559_s5 + $0x18] sm:$0xff]  }
 0x190   : > { %1605 = vmatpush1.bf16.msra.mxu1 %v3914_v24 }
 0x191   : > { %1606 = vmatprep.subr.bf16.mxu1 %v3919_v13  ;;  %v3977_v13 = vld [vmem:[%s5559_s5 + $0x70] sm:$0xff]  }
 0x193   : > { %1430 = vmatmul.mubr.bf16.gmra.mxu1 %v4953_v4 }
 0x194   : > { %3335 = vmatprep.mubr.msk.bf16.mxu1 %vm1145_vm2, %v4960_v60  ;;  %1607 = vmatpush1.bf16.msra.mxu1 %v3917_v53  ;;  %v3978_v53 = vld [vmem:[%s5559_s5 + $0x10] sm:$0xff]  }
 0x195   : > { %1608 = vmatprep.subr.bf16.mxu1 %v3922_v52 }
 0x198   : > { %1609 = vmatpush1.bf16.msra.mxu1 %v3920_v41  ;;  %v3980_v41 = vld [vmem:[%s5559_s5 + $0x8] sm:$0xff]  }
 0x199   : > { %1610 = vmatprep.subr.bf16.mxu1 %v3925_v31 }
 0x19b   : > { %1440 = vmatmul.mubr.bf16.gmra.mxu1 %v4976_v10 }
 0x19c   : > { %3336 = vmatprep.mubr.msk.bf16.mxu1 %vm1145_vm2, %v4983_v38  ;;  %1611 = vmatpush1.bf16.msra.mxu1 %v3923_v27 }
 0x19d   : > { %1612 = vmatprep.subr.bf16.mxu1 %v3928_v20  ;;  %v3982_v20 = vld [vmem:[%s5559_s5] sm:$0xff]  }
 0x1a0   : > { %1613 = vmatpush1.bf16.msra.mxu1 %v3926_v51  ;;  %v3983_v51 = vld [vmem:[%s5559_s5 + $0x58] sm:$0xff]  }
 0x1a1   : > { %3380 = vmatprep.subr.msk.bf16.mxu1 %vm1161_vm1, %v3379_v14  ;;  %v3984_v14 = vld [vmem:[%s5559_s5 + $0x48] sm:$0xff]  }
 0x1a3   : > { %1450 = vmatmul.mubr.bf16.gmra.mxu1 %v4996_v48 }
 0x1a4   : > { %1625 = vmatpush2.bf16.msra.mxu1 %v1593_v35  ;;  %3381 = vmatprep.mubr.msk.bf16.mxu1 %vm1145_vm2, %v1001_v0  ;;  %v3969_v0 = vld [vmem:[%s5559_s5 + $0x38] sm:$0xff]   ;;  %v3985_v35 = vld [vmem:[%s5559_s5 + $0x50] sm:$0xff]  }
 0x1a5   : > { %1626 = vmatprep.subr.bf16.mxu1 %v3933_v42  ;;  %v3986_v42 = vld [vmem:[%s5559_s5 + $0x40] sm:$0xff]  }
 0x1a8   : > { %1627 = vmatpush2.bf16.msra.mxu1 %v3931_v63 }
 0x1a9   : > { %1628 = vmatprep.subr.bf16.mxu1 %v3936_v8 }
 0x1ac   : > { %1629 = vmatpush2.bf16.msra.mxu1 %v3934_v37  ;;  %v3987_v37 = vld [vmem:[%s5559_s5 + $0x98] sm:$0xff]  }
 0x1ad   : > { %2080 = vmatprep.subr.bf16.mxu1 %v3939_v54 }
 0x1af   : > { %1631 = vmatmul.mubr.bf16.vlgmr.msra.gmra.mxu1 %v1000_v17  ;;  %v3975_v17 = vld [vmem:[%s5559_s5 + $0x78] sm:$0xff]  }
 0x1b0   : > { %3382 = vmatprep.mubr.msk.bf16.mxu1 %vm1145_vm2, %v4938_v34  ;;  %2081 = vmatpush1.bf16.msra.mxu1 %v3937_v36  ;;  %v3989_v36 = vld [vmem:[%s5559_s5 + $0x90] sm:$0xff]  }
 0x1b1   : > { %2082 = vmatprep.subr.bf16.mxu1 %v3942_v46 }
 0x1b4   : > { %2083 = vmatpush1.bf16.msra.mxu1 %v3940_v32 }
 0x1b5   : > { %2084 = vmatprep.subr.bf16.mxu1 %v3945_v55 }
 0x1b7   : > { %1641 = vmatmul.mubr.bf16.gmra.mxu1 %v4953_v4 }
 0x1b8   : > { %3383 = vmatprep.mubr.msk.bf16.mxu1 %vm1145_vm2, %v4960_v60  ;;  %2085 = vmatpush1.bf16.msra.mxu1 %v3943_v28 }
 0x1b9   : > { %2086 = vmatprep.subr.bf16.mxu1 %v3948_v45 }
 0x1bc   : > { %2087 = vmatpush1.bf16.msra.mxu1 %v3946_v5 }
 0x1bd   : > { %2088 = vmatprep.subr.bf16.mxu1 %v3951_v7 }
 0x1bf   : > { %1651 = vmatmul.mubr.bf16.gmra.mxu1 %v4976_v10 }
 0x1c0   : > { %3384 = vmatprep.mubr.msk.bf16.mxu1 %vm1145_vm2, %v4983_v38  ;;  %2089 = vmatpush1.bf16.msra.mxu1 %v3949_v16 }
 0x1c1   : > { %2090 = vmatprep.subr.bf16.mxu1 %v3954_v43 }
 0x1c4   : > { %2091 = vmatpush1.bf16.msra.mxu1 %v3952_v11 }
 0x1c5   : > { %2092 = vmatprep.subr.bf16.mxu1 %v3957_v12 }
 0x1c7   : > { %1661 = vmatmul.mubr.bf16.gmra.mxu1 %v4996_v48 }
 0x1c8   : > { %3385 = vmatprep.mubr.msk.bf16.mxu1 %vm1145_vm2, %v4886_v1  ;;  %2093 = vmatpush1.bf16.msra.mxu1 %v3955_v15 }
 0x1c9   : > { %2094 = vmatprep.subr.bf16.mxu1 %v3960_v18 }
 0x1cc   : > { %2095 = vmatpush1.bf16.msra.mxu1 %v3958_v49 }
 0x1cd   : > { %3478 = vmatprep.subr.msk.bf16.mxu1 %vm1161_vm1, %v3477_v6 }
 0x1cf   : > { %1671 = vmatmul.mubr.bf16.gmra.mxu1 %v4880_v61 }
 0x1d0   : > { %2107 = vmatpush2.bf16.msra.mxu1 %v2075_v47  ;;  %3479 = vmatprep.mubr.msk.bf16.mxu1 %vm1145_vm2, %v4938_v34 }
 0x1d1   : > { %2108 = vmatprep.subr.bf16.mxu1 %v3965_v25 }
 0x1d4   : > { %2109 = vmatpush2.bf16.msra.mxu1 %v3963_v33 }
 0x1d5   : > { %2110 = vmatprep.subr.bf16.mxu1 %v3968_v26 }
 0x1d8   : > { %2111 = vmatpush2.bf16.msra.mxu1 %v3966_v29 }
 0x1d9   : > { %2450 = vmatprep.subr.bf16.mxu1 %v4255_v58 }
 0x1db   : > { %2113 = vmatmul.mubr.bf16.vlgmr.msra.gmra.mxu1 %v4953_v4 }
 0x1dc   : > { %3480 = vmatprep.mubr.msk.bf16.mxu1 %vm1145_vm2, %v4960_v60  ;;  %2451 = vmatpush1.bf16.msra.mxu1 %v3969_v0  ;;  %v3979_v60 = vld [vmem:[%s5559_s5 + $0x68] sm:$0xff]  }
 0x1dd   : > { %2452 = vmatprep.subr.bf16.mxu1 %v4255_v58 }
 0x1e3   : > { %2123 = vmatmul.mubr.bf16.gmra.mxu1 %v4976_v10  ;;  %v3981_v10 = vld [vmem:[%s5559_s5 + $0x60] sm:$0xff]  }
 0x1e4   : > { %3481 = vmatprep.mubr.msk.bf16.mxu1 %vm1145_vm2, %v4983_v38 }
 0x1eb   : > { %2133 = vmatmul.mubr.bf16.gmra.mxu1 %v4996_v48 }
 0x1ec   : > { %3482 = vmatprep.mubr.msk.bf16.mxu1 %vm1145_vm2, %v4886_v1  ;;  %v3971_v1 = vld [vmem:[%s5559_s5 + $0x88] sm:$0xff]  }
 0x1ed   : > { %2348 = vmatpush1.bf16.msra.mxu0 %v3971_v1 }
 0x1ee   : > { %2349 = vmatprep.subr.bf16.mxu0 %v4255_v58 }
 0x1f3   : > { %2143 = vmatmul.mubr.bf16.gmra.mxu1 %v4880_v61  ;;  %v3970_v61 = vld [vmem:[%s5559_s5 + $0x30] sm:$0xff]  }
 0x1f4   : > { %3483 = vmatprep.mubr.msk.bf16.mxu1 %vm1145_vm2, %v1965_v2  ;;  %2453 = vmatpush1.bf16.msra.mxu1 %v3970_v61  ;;  %v3974_v2 = vld [vmem:[%s5559_s5 + $0x20] sm:$0xff]  }
 0x1f5   : > { %2454 = vmatprep.subr.bf16.mxu1 %v4255_v58 }
 0x1f8   : > { %2455 = vmatpush1.bf16.msra.mxu1 %v3972_v9 }
 0x1f9   : > { %2456 = vmatprep.subr.bf16.mxu1 %v4255_v58 }
 0x1fb   : > { %2153 = vmatmul.mubr.bf16.gmra.mxu1 %v1964_v23  ;;  %v3973_v23 = vld [vmem:[%s5559_s5 + $0x80] sm:$0xff]  }
 0x1fc   : > { %2350 = vmatpush1.bf16.msra.mxu0 %v3973_v23  ;;  %2457 = vmatpush1.bf16.msra.mxu1 %v3974_v2 }
 0x1fd   : > { %2351 = vmatprep.subr.bf16.mxu0 %v4255_v58  ;;  %2458 = vmatprep.subr.bf16.mxu1 %v4255_v58 }
 0x200   : > { %2352 = vmatpush1.bf16.msra.mxu0 %v3975_v17  ;;  %2459 = vmatpush1.bf16.msra.mxu1 %v3976_v44 }
 0x201   : > { %2353 = vmatprep.subr.bf16.mxu0 %v4255_v58  ;;  %2460 = vmatprep.subr.bf16.mxu1 %v4255_v58 }
 0x204   : > { %2354 = vmatpush1.bf16.msra.mxu0 %v3977_v13  ;;  %2461 = vmatpush1.bf16.msra.mxu1 %v3978_v53 }
 0x205   : > { %2355 = vmatprep.subr.bf16.mxu0 %v4255_v58  ;;  %2462 = vmatprep.subr.bf16.mxu1 %v4255_v58 }
 0x208   : > { %2356 = vmatpush1.bf16.msra.mxu0 %v3979_v60  ;;  %2463 = vmatpush1.bf16.msra.mxu1 %v3980_v41 }
 0x209   : > { %2357 = vmatprep.subr.bf16.mxu0 %v4255_v58  ;;  %2464 = vmatprep.subr.bf16.mxu1 %v4255_v58 }
 0x20c   : > { %2358 = vmatpush1.bf16.msra.mxu0 %v3981_v10  ;;  %2465 = vmatpush1.bf16.msra.mxu1 %v3982_v20 }
 0x20d   : > { %2359 = vmatprep.subr.bf16.mxu0 %v4255_v58  ;;  %2478 = vmatprep.subr.bf16.mxu1 %v4255_v58 }
 0x210   : > { %2360 = vmatpush1.bf16.msra.mxu0 %v3983_v51  ;;  %2479 = vmatpush2.bf16.msra.mxu1 %v3984_v14 }
 0x211   : > { %2361 = vmatprep.subr.bf16.mxu0 %v4255_v58  ;;  %2480 = vmatprep.subr.bf16.mxu1 %v4255_v58 }
 0x214   : > { %2362 = vmatpush1.bf16.msra.mxu0 %v3985_v35  ;;  %2481 = vmatpush2.bf16.msra.mxu1 %v3986_v42 }
 0x215   : > { %2375 = vmatprep.subr.bf16.mxu0 %v4255_v58  ;;  %2707 = vmatprep.subr.bf16.mxu1 %v4255_v58 }
 0x217   : > { %v5126_v3 = vpop.f32.mrf.mxu1 }
 0x218   : > { %2376 = vmatpush2.bf16.msra.mxu0 %v3987_v37 }
 0x219   : > { %v5128_v19 = vpop.f32.mrf.mxu1  ;;  %2377 = vmatprep.subr.bf16.mxu0 %v4255_v58 }
 0x21b   : > { %v5132_v22 = vpop.f32.mrf.mxu1 }
 0x21c   : > { %2378 = vmatpush2.bf16.msra.mxu0 %v3989_v36 }
 0x21d   : > { %v5140_v50 = vpop.f32.mrf.mxu1  ;;  %2578 = vmatprep.subr.bf16.mxu0 %v4255_v58 }
 0x21f   : > { %v5144_v30 = vpop.f32.mrf.mxu1 }
 0x221   : > { %v5152_v34 = vpop.f32.mrf.mxu1 }
 0x223   : > { %v5156_v24 = vpop.f32.mrf.mxu1 }
 0x225   : > { %v1218_v4 = vpop.f32.mrf.mxu1 }
 0x227   : > { %v1222_v52 = vpop.f32.mrf.mxu1 }
 0x229   : > { %v1224_v31 = vpop.f32.mrf.mxu1 }
 0x22b   : > { %v1226_v27 = vpop.f32.mrf.mxu1 }
 0x22d   : > { %v1228_v38 = vpop.f32.mrf.mxu1 }
 0x22f   : > { %v1232_v39 = vpop.f32.mrf.mxu1 }
 0x231   : > { %v1234_v40 = vpop.f32.mrf.mxu1 }
 0x233   : > { %v1236_v48 = vpop.f32.mrf.mxu1 }
 0x235   : > { %v1238_v63 = vpop.f32.mrf.mxu1 }
 0x237   : > { %v1242_v8 = vpop.f32.mrf.mxu1 }
 0x239   : > { %v1244_v54 = vpop.f32.mrf.mxu1 }
 0x23b   : > { %v1246_v46 = vpop.f32.mrf.mxu1 }
 0x23d   : > { %v1248_v32 = vpop.f32.mrf.mxu1 }
 0x243   : > { %v1411_v55 = vpop.f32.mrf.mxu1 }
 0x244   : > { %v5207_v28 = vadd.f32 %v1411_v55, %v5126_v3 }
 0x245   : > { %v1413_v45 = vpop.f32.mrf.mxu1 }
 0x246   : > { %v5210_v5 = vadd.f32 %v1413_v45, %v5128_v19 }
 0x247   : > { %v1415_v7 = vpop.f32.mrf.mxu1 }
 0x248   : > { %v5213_v16 = vadd.f32 %v1415_v7, %v5132_v22 }
 0x249   : > { %v1417_v43 = vpop.f32.mrf.mxu1 }
 0x24a   : > { %v5216_v11 = vadd.f32 %v1417_v43, %v5140_v50 }
 0x24b   : > { %v1421_v12 = vpop.f32.mrf.mxu1 }
 0x24c   : > { %v5219_v15 = vadd.f32 %v1421_v12, %v5144_v30 }
 0x24d   : > { %v1423_v18 = vpop.f32.mrf.mxu1 }
 0x24e   : > { %v5222_v56 = vadd.f32 %v1423_v18, %v5152_v34 }
 0x24f   : > { %v1425_v49 = vpop.f32.mrf.mxu1 }
 0x250   : > { %v5225_v6 = vadd.f32 %v1425_v49, %v5156_v24 }
 0x251   : > { %v1427_v21 = vpop.f32.mrf.mxu1 }
 0x252   : > { %v5227_v47 = vadd.f32 %v1427_v21, %v1218_v4 }
 0x253   : > { %v1431_v25 = vpop.f32.mrf.mxu1 }
 0x254   : > { %v1432_v33 = vadd.f32 %v1431_v25, %v1222_v52 }
 0x255   : > { %v1433_v26 = vpop.f32.mrf.mxu1 }
 0x256   : > { %v5229_v29 = vadd.f32 %v1433_v26, %v1224_v31 }
 0x257   : > { %v1435_v0 = vpop.f32.mrf.mxu1 }
 0x258   : > { %v1436_v61 = vadd.f32 %v1435_v0, %v1226_v27  ;;  %v1873_v27 = vpop.f32.mrf.mxu0 }
 0x259   : > { %v1437_v1 = vpop.f32.mrf.mxu1 }
 0x25a   : > { %v5231_v9 = vadd.f32 %v1437_v1, %v1228_v38  ;;  %v1875_v38 = vpop.f32.mrf.mxu0 }
 0x25b   : > { %v1441_v3 = vpop.f32.mrf.mxu1 }
 0x25c   : > { %v5233_v19 = vadd.f32 %v1441_v3, %v1232_v39  ;;  %v1877_v14 = vpop.f32.mrf.mxu0 }
 0x25d   : > { %v1443_v22 = vpop.f32.mrf.mxu1 }
 0x25e   : > { %v5235_v23 = vadd.f32 %v1443_v22, %v1234_v40  ;;  %v1879_v35 = vpop.f32.mrf.mxu0  ;;  %v2183_v22 = vld [vmem:[%s5558_s4] sm:$0x3] }
 0x25f   : > { %v1445_v2 = vpop.f32.mrf.mxu1 }
 0x260   : > { %v5237_v50 = vadd.f32 %v1445_v2, %v1236_v48  ;;  %v1883_v37 = vpop.f32.mrf.mxu0 }
 0x261   : > { %v1447_v30 = vpop.f32.mrf.mxu1 }
 0x262   : > { %v5239_v17 = vadd.f32 %v1447_v30, %v1238_v63 }
 0x263   : > { %v1451_v44 = vpop.f32.mrf.mxu1 }
 0x264   : > { %v1452_v34 = vadd.f32 %v1451_v44, %v1242_v8 }
 0x265   : > { %v1453_v24 = vpop.f32.mrf.mxu1 }
 0x266   : > { %v5241_v13 = vadd.f32 %v1453_v24, %v1244_v54 }
 0x267   : > { %v1455_v53 = vpop.f32.mrf.mxu1 }
 0x268   : > { %v1456_v4 = vadd.f32 %v1455_v53, %v1246_v46  ;;  %v5275_v53 = vrot.slane %v2183_v22, %v443_v62 }
 0x269   : > { %v1457_v52 = vpop.f32.mrf.mxu1 }
 0x26a   : > { %v5243_v60 = vadd.f32 %v1457_v52, %v1248_v32  ;;  %v1885_v32 = vpop.f32.mrf.mxu0 }
 0x26c   : > { %v1887_v7 = vpop.f32.mrf.mxu0 }
 0x26e   : > { %v1889_v18 = vpop.f32.mrf.mxu0 }
 0x26f   : > { %v1632_v41 = vpop.f32.mrf.mxu1 }
 0x271   : > { %v1634_v31 = vpop.f32.mrf.mxu1 }
 0x272   : > { %v1682_v3 = vadd.f32 %v1634_v31, %v5210_v5 }
 0x273   : > { %v1636_v10 = vpop.f32.mrf.mxu1 }
 0x274   : > { %v1683_v30 = vadd.f32 %v1636_v10, %v5213_v16  ;;  %v1923_v52 = vadd.f32 %v1875_v38, %v1682_v3 }
 0x275   : > { %v1638_v20 = vpop.f32.mrf.mxu1 }
 0x276   : > { %v1924_v16 = vadd.f32 %v1877_v14, %v1683_v30 }
 0x277   : > { %v1642_v39 = vpop.f32.mrf.mxu1 }
 0x278   : > { %v1685_v31 = vadd.f32 %v1642_v39, %v5219_v15 }
 0x279   : > { %v1644_v51 = vpop.f32.mrf.mxu1 }
 0x27a   : > { %v1686_v10 = vadd.f32 %v1644_v51, %v5222_v56 }
 0x27b   : > { %v1646_v40 = vpop.f32.mrf.mxu1 }
 0x27c   : > { %v1687_v38 = vadd.f32 %v1646_v40, %v5225_v6  ;;  %v1927_v14 = vadd.f32 %v1885_v32, %v1686_v10 }
 0x27d   : > { %v1648_v48 = vpop.f32.mrf.mxu1 }
 0x27e   : > { %v1688_v56 = vadd.f32 %v1648_v48, %v5227_v47  ;;  %v1928_v30 = vadd.f32 %v1887_v7, %v1687_v38 }
 0x27f   : > { %v1652_v42 = vpop.f32.mrf.mxu1 }
 0x280   : > { %v5245_v63 = vadd.f32 %v1652_v42, %v1432_v33  ;;  %v1893_v33 = vpop.f32.mrf.mxu0 }
 0x281   : > { %v1654_v8 = vpop.f32.mrf.mxu1 }
 0x282   : > { %v1895_v1 = vpop.f32.mrf.mxu0  ;;  %v1690_v40 = vadd.f32 %v1654_v8, %v5229_v29 }
 0x283   : > { %v1656_v54 = vpop.f32.mrf.mxu1 }
 0x284   : > { %v5247_v36 = vadd.f32 %v1656_v54, %v1436_v61  ;;  %v1681_v61 = vadd.f32 %v1632_v41, %v5207_v28  ;;  %v1684_v28 = vadd.f32 %v1638_v20, %v5216_v11  ;;  %v5280_v41 = vrot.slane %v2183_v22, %v447_v59 }
 0x285   : > { %v5249_v46 = vpop.f32.mrf.mxu1  ;;  %v1931_v7 = vadd.f32 %v1895_v1, %v1690_v40 }
 0x286   : > { %v1922_v44 = vadd.f32 %v1873_v27, %v1681_v61  ;;  %v1926_v61 = vadd.f32 %v1883_v37, %v1685_v31  ;;  %v1692_v29 = vadd.f32 %v5249_v46, %v5231_v9 }
 0x287   : > { %v5251_v55 = vpop.f32.mrf.mxu1 }
 0x289   : > { %v5253_v45 = vpop.f32.mrf.mxu1 }
 0x28a   : > { %v1694_v1 = vadd.f32 %v5253_v45, %v5235_v23 }
 0x28b   : > { %v5255_v43 = vpop.f32.mrf.mxu1 }
 0x28c   : > { %v1695_v38 = vadd.f32 %v5255_v43, %v5237_v50 }
 0x28d   : > { %v5257_v12 = vpop.f32.mrf.mxu1 }
 0x28f   : > { %v1672_v49 = vpop.f32.mrf.mxu1 }
 0x290   : > { %v5259_v21 = vadd.f32 %v1672_v49, %v1452_v34  ;;  %v1897_v34 = vpop.f32.mrf.mxu0 }
 0x291   : > { %v5261_v25 = vpop.f32.mrf.mxu1 }
 0x292   : > { %v1899_v27 = vpop.f32.mrf.mxu0 }
 0x293   : > { %v1676_v26 = vpop.f32.mrf.mxu1 }
 0x294   : > { %v5263_v0 = vadd.f32 %v1676_v26, %v1456_v4  ;;  %v1925_v26 = vadd.f32 %v1879_v35, %v1684_v28  ;;  %v1903_v15 = vpop.f32.mrf.mxu0  ;;  %v1929_v28 = vadd.f32 %v1889_v18, %v1688_v56  ;;  %v1693_v18 = vadd.f32 %v5251_v55, %v5233_v19 }
 0x295   : > { %v5270_v2 = vpop.f32.mrf.mxu1 }
 0x296   : > { %v1905_v6 = vpop.f32.mrf.mxu0  ;;  %v1934_v55 = vadd.f32 %v1903_v15, %v1693_v18 }
 0x29b   : > { %v2114_v24 = vpop.f32.mrf.mxu1 }
 0x29c   : > { %v2163_v4 = vadd.f32 %v2114_v24, %v1922_v44 }
 0x29d   : > { %v2116_v5 = vpop.f32.mrf.mxu1 }
 0x29e   : > { %v2164_v42 = vadd.f32 %v2116_v5, %v1923_v52  ;;  %v2195_v54 = vadd.f32 %v5275_v53, %v2163_v4  ;;  %v1930_v52 = vadd.f32 %v1893_v33, %v5245_v63  ;;  %v1907_v5 = vpop.f32.mrf.mxu0  ;;  %v1932_v63 = vadd.f32 %v1897_v34, %v5247_v36 }
 0x29f   : > { %v2118_v62 = vpop.f32.mrf.mxu1  ;;  %v1936_v43 = vadd.f32 %v1907_v5, %v1695_v38  ;;  %v3993_v38 = vld [vmem:[%s5559_s5 + $0xd0] sm:$0xff]  }
 0x2a0   : > { %v2165_v49 = vadd.f32 %v2118_v62, %v1924_v16  ;;  %v2196_v11 = vadd.f32 %v5280_v41, %v2164_v42  ;;  %4145 = vtanh.f32 %v2195_v54  ;;  %v1909_v33 = vpop.f32.mrf.mxu0 }
 0x2a1   : > { %v2120_v20 = vpop.f32.mrf.mxu1 }
 0x2a2   : > { %v2197_v57 = vadd.f32 %v5275_v53, %v2165_v49  ;;  %v2166_v59 = vadd.f32 %v2120_v20, %v1925_v26  ;;  %v1933_v49 = vadd.f32 %v1899_v27, %v1692_v29  ;;  %v1913_v45 = vpop.f32.mrf.mxu0 }
 0x2a3   : > { %v2124_v39 = vpop.f32.mrf.mxu1 }
 0x2a4   : > { %4147 = vtanh.f32 %v2197_v57  ;;  %v2198_v51 = vadd.f32 %v5280_v41, %v2166_v59  ;;  %v2167_v3 = vadd.f32 %v2124_v39, %v1926_v61  ;;  %v1696_v59 = vadd.f32 %v5257_v12, %v5239_v17 }
 0x2a5   : > { %4149 = vtanh.f32 %v2196_v11  ;;  %v2126_v35 = vpop.f32.mrf.mxu1  ;;  %v1935_v61 = vadd.f32 %v1905_v6, %v1694_v1  ;;  %v1698_v17 = vadd.f32 %v5261_v25, %v5241_v13  ;;  %v1938_v13 = vadd.f32 %v1913_v45, %v5259_v21  ;;  %v3990_v25 = vld [vmem:[%s5559_s5 + $0x120] sm:$0xff]  }
 0x2a6   : > { %4151 = vtanh.f32 %v2198_v51  ;;  %v2168_v22 = vadd.f32 %v2126_v35, %v1927_v14  ;;  %v2199_v37 = vadd.f32 %v5275_v53, %v2167_v3  ;;  %v3988_v3 = vld [vmem:[%s5559_s5 + $0x128] sm:$0xff]   ;;  %v1915_v35 = vpop.f32.mrf.mxu0 }
 0x2a7   : > { %v2128_v44 = vpop.f32.mrf.mxu1  ;;  %v1939_v29 = vadd.f32 %v1915_v35, %v1698_v17  ;;  %v4000_v35 = vld [vmem:[%s5559_s5 + $0xf8] sm:$0xff]  }
 0x2a8   : > { %v2169_v24 = vadd.f32 %v2128_v44, %v1928_v30  ;;  %v2200_v32 = vadd.f32 %v5280_v41, %v2168_v22  ;;  %4153 = vtanh.f32 %v2199_v37  ;;  %v1937_v37 = vadd.f32 %v1909_v33, %v1696_v59  ;;  %v1917_v5 = vpop.f32.mrf.mxu0  ;;  %v3992_v33 = vld [vmem:[%s5559_s5 + $0x118] sm:$0xff]   ;;  %v3995_v59 = vld [vmem:[%s5559_s5 + $0xc8] sm:$0xff]  }
 0x2a9   : > { %v2130_v47 = vpop.f32.mrf.mxu1 }
 0x2aa   : > { %v2201_v48 = vadd.f32 %v5275_v53, %v2169_v24  ;;  %v2170_v4 = vadd.f32 %v2130_v47, %v1929_v28  ;;  %v1919_v1 = vpop.f32.mrf.mxu0 }
 0x2ab   : > { %v2134_v31 = vpop.f32.mrf.mxu1 }
 0x2ac   : > { %4155 = vtanh.f32 %v2201_v48  ;;  %v2202_v8 = vadd.f32 %v5280_v41, %v2170_v4  ;;  %v2171_v42 = vadd.f32 %v2134_v31, %v1930_v52  ;;  %v1700_v31 = vadd.f32 %v5270_v2, %v5243_v60  ;;  %v3991_v2 = vld [vmem:[%s5559_s5 + $0xd8] sm:$0xff]  }
 0x2ad   : > { %4157 = vtanh.f32 %v2200_v32  ;;  %v2136_v16 = vpop.f32.mrf.mxu1  ;;  %v4146_v46 = vpop.eup %4145 }
 0x2ae   : > { %4159 = vtanh.f32 %v2202_v8  ;;  %v2172_v10 = vadd.f32 %v2136_v16, %v1931_v7  ;;  %v2203_v54 = vadd.f32 %v5275_v53, %v2171_v42  ;;  %v1940_v16 = vadd.f32 %v1917_v5, %v5263_v0 }
 0x2af   : > { %v2138_v9 = vpop.f32.mrf.mxu1 }
 0x2b0   : > { %v2173_v62 = vadd.f32 %v2138_v9, %v1932_v63  ;;  %v2204_v11 = vadd.f32 %v5280_v41, %v2172_v10  ;;  %4161 = vtanh.f32 %v2203_v54 }
 0x2b1   : > { %v4148_v26 = vpop.eup %4147  ;;  %v2140_v19 = vpop.f32.mrf.mxu1 }
 0x2b2   : > { %v4150_v20 = vpop.eup %4149  ;;  %v2205_v36 = vadd.f32 %v5275_v53, %v2173_v62  ;;  %v2174_v34 = vadd.f32 %v2140_v19, %v1933_v49  ;;  %v2235_v57 = vadd.f32 %v4148_v26, %v4146_v46  ;;  %v1941_v62 = vadd.f32 %v1919_v1, %v1700_v31  ;;  %v4010_v31 = vld [vmem:[%s5559_s5 + $0x170] sm:$0xff]   ;;  %v4021_v1 = vld [vmem:[%s5561_s7 + $0x28] sm:$0xff]  }
 0x2b3   : > { %v4152_v23 = vpop.eup %4151  ;;  %v2144_v27 = vpop.f32.mrf.mxu1 }
 0x2b4   : > { %4163 = vtanh.f32 %v2205_v36  ;;  %v2206_v39 = vadd.f32 %v5280_v41, %v2174_v34  ;;  %v2175_v15 = vadd.f32 %v2144_v27, %v1934_v55  ;;  %v2236_v14 = vadd.f32 %v4152_v23, %v4150_v20  ;;  %v3994_v36 = vld [vmem:[%s5559_s5 + $0x110] sm:$0xff]   ;;  %v3996_v27 = vld [vmem:[%s5559_s5 + $0x108] sm:$0xff]  }
 0x2b5   : > { %4165 = vtanh.f32 %v2204_v11  ;;  %v2146_v56 = vpop.f32.mrf.mxu1  ;;  %v2257_v30 = vpack.c.bf16 %v2235_v57, %v2235_v57  ;;  %v4154_v6 = vpop.eup %4153 }
 0x2b6   : > { %4167 = vtanh.f32 %v2206_v39  ;;  %v2176_v50 = vadd.f32 %v2146_v56, %v1935_v61  ;;  %v2258_v51 = vpack.c.bf16 %v2236_v14, %v2236_v14  ;;  %v2207_v12 = vadd.f32 %v5275_v53, %v2175_v15  ;;  %v3997_v15 = vld [vmem:[%s5559_s5 + $0xc0] sm:$0xff]  }
 0x2b7   : > { %v2148_v22 = vpop.f32.mrf.mxu1  ;;  %v3998_v14 = vld [vmem:[%s5559_s5 + $0x100] sm:$0xff]  }
 0x2b8   : > { %v2177_v40 = vadd.f32 %v2148_v22, %v1936_v43  ;;  %3525 = vmatprep.mubr.msk.bf16.mxu1 %vm677_vm0, %v2258_v51  ;;  %v2208_v24 = vadd.f32 %v5280_v41, %v2176_v50  ;;  %4169 = vtanh.f32 %v2207_v12 }
 0x2b9   : > { %v4156_v44 = vpop.eup %4155  ;;  %v2150_v28 = vpop.f32.mrf.mxu1  ;;  %2483 = vmatmul.mubr.bf16.vlgmr.msra.gmra.mxu1 %v2257_v30  ;;  %v4001_v30 = vld [vmem:[%s5559_s5 + $0xb0] sm:$0xff]  }
 0x2ba   : > { %v4158_v32 = vpop.eup %4157  ;;  %v2209_v47 = vadd.f32 %v5275_v53, %v2177_v40  ;;  %v2178_v48 = vadd.f32 %v2150_v28, %v1937_v37  ;;  %2708 = vmatpush1.bf16.msra.mxu1 %v3988_v3  ;;  %v2259_v4 = vadd.f32 %v4156_v44, %v4154_v6  ;;  %v3999_v3 = vld [vmem:[%s5559_s5 + $0xb8] sm:$0xff]   ;;  %v4002_v6 = vld [vmem:[%s5559_s5 + $0xf0] sm:$0xff]  }
 0x2bb   : > { %v4160_v52 = vpop.eup %4159  ;;  %v2154_v7 = vpop.f32.mrf.mxu1  ;;  %2709 = vmatprep.subr.bf16.mxu1 %v4255_v58  ;;  %v4004_v28 = vld [vmem:[%s5559_s5 + $0x138] sm:$0xff]  }
 0x2bc   : > { %4171 = vtanh.f32 %v2209_v47  ;;  %v2210_v8 = vadd.f32 %v5280_v41, %v2178_v48  ;;  %v2179_v42 = vadd.f32 %v2154_v7, %v1938_v13  ;;  %v2260_v21 = vadd.f32 %v4160_v52, %v4158_v32  ;;  %v4005_v32 = vld [vmem:[%s5559_s5 + $0xa0] sm:$0xff]   ;;  %v4006_v47 = vld [vmem:[%s5559_s5 + $0x130] sm:$0xff]   ;;  %v4007_v48 = vld [vmem:[%s5559_s5 + $0xe8] sm:$0xff]  }
 0x2bd   : > { %4173 = vtanh.f32 %v2208_v24  ;;  %v2156_v18 = vpop.f32.mrf.mxu1  ;;  %v2282_v9 = vpack.c.bf16 %v2259_v4, %v2259_v4  ;;  %v4162_v0 = vpop.eup %4161  ;;  %v4003_v24 = vld [vmem:[%s5559_s5 + $0xa8] sm:$0xff]   ;;  %v4009_v4 = vld [vmem:[%s5559_s5 + $0x178] sm:$0xff]  }
 0x2be   : > { %4175 = vtanh.f32 %v2210_v8  ;;  %v2211_v10 = vadd.f32 %v5275_v53, %v2179_v42  ;;  %v2180_v63 = vadd.f32 %v2156_v18, %v1939_v29  ;;  %2710 = vmatpush1.bf16.msra.mxu1 %v3990_v25  ;;  %v2283_v60 = vpack.c.bf16 %v2260_v21, %v2260_v21  ;;  %v4008_v25 = vld [vmem:[%s5559_s5 + $0xe0] sm:$0xff]   ;;  %v4011_v7 = vld [vmem:[%s5559_s5 + $0x168] sm:$0xff]   ;;  %v4013_v8 = vld [vmem:[%s5559_s5 + $0x158] sm:$0xff]  }
 0x2bf   : > { %v2158_v54 = vpop.f32.mrf.mxu1  ;;  %2711 = vmatprep.subr.bf16.mxu1 %v4255_v58  ;;  %v4012_v29 = vld [vmem:[%s5559_s5 + $0x160] sm:$0xff]   ;;  %v4014_v42 = vld [vmem:[%s5559_s5 + $0x150] sm:$0xff]   ;;  %v4015_v21 = vld [vmem:[%s5559_s5 + $0x148] sm:$0xff]  }
 0x2c0   : > { %v2181_v46 = vadd.f32 %v2158_v54, %v1940_v16  ;;  %3514 = vmatprep.mubr.msk.bf16.mxu0 %vm677_vm0, %v2283_v60  ;;  %v2212_v26 = vadd.f32 %v5280_v41, %v2180_v63  ;;  %4177 = vtanh.f32 %v2211_v10  ;;  %v4016_v18 = vld [vmem:[%s5559_s5 + $0x140] sm:$0xff]   ;;  %v4017_v16 = vld [vmem:[%s5559_s5 + $0x188] sm:$0xff]   ;;  %v4019_v60 = vld [vmem:[%s5561_s7 + $0x38] ss:$0 sps:$4 sm:$0xff]  }
 0x2c1   : > { %v4164_v49 = vpop.eup %4163  ;;  %v2160_v11 = vpop.f32.mrf.mxu1  ;;  %2380 = vmatmul.mubr.bf16.vlgmr.msra.gmra.mxu0 %v2282_v9  ;;  %v4018_v10 = vld [vmem:[%s5559_s5 + $0x180] sm:$0xff]   ;;  %v4023_v9 = vld [vmem:[%s5561_s7 + $0x18] sm:$0xff]  }
 0x2c2   : > { %v4166_v19 = vpop.eup %4165  ;;  %v2213_v55 = vadd.f32 %v5275_v53, %v2181_v46  ;;  %v2182_v20 = vadd.f32 %v2160_v11, %v1941_v62  ;;  %2579 = vmatpush1.bf16.msra.mxu0 %v3991_v2  ;;  %2712 = vmatpush1.bf16.msra.mxu1 %v3992_v33  ;;  %v5346_v34 = vadd.f32 %v4164_v49, %v4162_v0  ;;  %v4256_v2 = vmov 0.0   ;;  %v4022_v54 = vld [vmem:[%s5561_s7 + $0x20] sm:$0xff]   ;;  %v4024_v0 = vld [vmem:[%s5561_s7 + $0x10] sm:$0xff]   ;;  %v4025_v46 = vld [vmem:[%s5561_s7 + $0x8] sm:$0xff]  }
 0x2c3   : > { %v4168_v57 = vpop.eup %4167  ;;  %2580 = vmatprep.subr.bf16.mxu0 %v4255_v58  ;;  %2713 = vmatprep.subr.bf16.mxu1 %v4255_v58  ;;  %v2962_v33 = vsel %vm1161_vm1, %v4019_v60, 0  ;;  %v4026_v62 = vld [vmem:[%s5561_s7] sm:$0xff]  }
 0x2c4   : > { %4179 = vtanh.f32 %v2213_v55  ;;  %v2214_v53 = vadd.f32 %v5280_v41, %v2182_v20  ;;  %v2491_v23 = vadd.f32 %v4168_v57, %v4166_v19  ;;  %v2513_v52 = vpack.c.bf16 %v5346_v34, %v5346_v34 }
 0x2c5   : > { %4181 = vtanh.f32 %v2212_v26  ;;  %v4170_v61 = vpop.eup %4169 }
 0x2c6   : > { %4183 = vtanh.f32 %v2214_v53  ;;  %2581 = vmatpush1.bf16.msra.mxu0 %v3993_v38  ;;  %2714 = vmatpush1.bf16.msra.mxu1 %v3994_v36  ;;  %v2514_v45 = vpack.c.bf16 %v2491_v23, %v2491_v23 }
 0x2c7   : > { %2582 = vmatprep.subr.bf16.mxu0 %v4255_v58  ;;  %2715 = vmatprep.subr.bf16.mxu1 %v4255_v58 }
 0x2c8   : > { %3556 = vmatprep.mubr.msk.bf16.mxu0 %vm677_vm0, %v2514_v45 }
 0x2c9   : > { %v4172_v41 = vpop.eup %4171 }
 0x2ca   : > { %v4174_v39 = vpop.eup %4173  ;;  %2583 = vmatpush1.bf16.msra.mxu0 %v3995_v59  ;;  %2716 = vmatpush1.bf16.msra.mxu1 %v3996_v27  ;;  %v2619_v56 = vadd.f32 %v4172_v41, %v4170_v61 }
 0x2cb   : > { %v4176_v50 = vpop.eup %4175  ;;  %2584 = vmatprep.subr.bf16.mxu0 %v4255_v58  ;;  %2717 = vmatprep.subr.bf16.mxu1 %v4255_v58 }
 0x2cc   : > { %v2620_v43 = vadd.f32 %v4176_v50, %v4174_v39  ;;  %v2642_v13 = vpack.c.bf16 %v2619_v56, %v2619_v56  ;;  %v3619_v56 = vld [vmem:[%s5560_s6] ss:$0 sm:$0xff] }
 0x2cd   : > { %v4178_v17 = vpop.eup %4177 }
 0x2ce   : > { %2585 = vmatpush1.bf16.msra.mxu0 %v3997_v15  ;;  %2718 = vmatpush1.bf16.msra.mxu1 %v3998_v14  ;;  %v2643_v51 = vpack.c.bf16 %v2620_v43, %v2620_v43 }
 0x2cf   : > { %2586 = vmatprep.subr.bf16.mxu0 %v4255_v58  ;;  %2719 = vmatprep.subr.bf16.mxu1 %v4255_v58 }
 0x2d0   : > { %3587 = vmatprep.mubr.msk.bf16.mxu1 %vm677_vm0, %v2643_v51 }
 0x2d1   : > { %v4180_v12 = vpop.eup %4179 }
 0x2d2   : > { %v4182_v22 = vpop.eup %4181  ;;  %2587 = vmatpush1.bf16.msra.mxu0 %v3999_v3  ;;  %2720 = vmatpush1.bf16.msra.mxu1 %v4000_v35  ;;  %v2748_v40 = vadd.f32 %v4180_v12, %v4178_v17 }
 0x2d3   : > { %v4184_v37 = vpop.eup %4183  ;;  %2588 = vmatprep.subr.bf16.mxu0 %v4255_v58  ;;  %2721 = vmatprep.subr.bf16.mxu1 %v4255_v58 }
 0x2d4   : > { %v2749_v44 = vadd.f32 %v4184_v37, %v4182_v22  ;;  %v2771_v63 = vpack.c.bf16 %v2748_v40, %v2748_v40  ;;  %v4027_v40 = vld [vmem:[%s5563_s9 + $0x28] ss:$0 sps:$4 sm:$0x33]  }
 0x2d5   : > { %v3066_v37 = vsel %vm3064_vm5, %v4027_v40, 0 }
 0x2d6   : > { %2589 = vmatpush1.bf16.msra.mxu0 %v4001_v30  ;;  %2722 = vmatpush1.bf16.msra.mxu1 %v4002_v6  ;;  %v2772_v5 = vpack.c.bf16 %v2749_v44, %v2749_v44  ;;  %v4028_v44 = vld [vmem:[%s5563_s9 + $0x20] sm:$0xff]  }
 0x2d7   : > { %2590 = vmatprep.subr.bf16.mxu0 %v4255_v58  ;;  %2735 = vmatprep.subr.bf16.mxu1 %v4255_v58 }
 0x2da   : > { %2591 = vmatpush1.bf16.msra.mxu0 %v4003_v24  ;;  %2736 = vmatpush2.bf16.msra.mxu1 %v4004_v28  ;;  %v4029_v24 = vld [vmem:[%s5563_s9 + $0x18] sm:$0xff]   ;;  %v4030_v28 = vld [vmem:[%s5563_s9 + $0x10] sm:$0xff]  }
 0x2db   : > { %2592 = vmatprep.subr.bf16.mxu0 %v4255_v58  ;;  %2737 = vmatprep.subr.bf16.mxu1 %v4255_v58 }
 0x2de   : > { %2593 = vmatpush1.bf16.msra.mxu0 %v4005_v32  ;;  %2738 = vmatpush2.bf16.msra.mxu1 %v4006_v47  ;;  %v4031_v32 = vld [vmem:[%s5563_s9 + $0x8] sm:$0xff]   ;;  %v4032_v47 = vld [vmem:[%s5563_s9] sm:$0xff]  }
 0x2df   : > { %2606 = vmatprep.subr.bf16.mxu0 %v4255_v58  ;;  %3659 = vmatprep.subr.bf16.mxu1 %v4256_v2 }
 0x2e1   : > { %2740 = vmatmul.mubr.bf16.vlgmr.msra.gmra.mxu1 %v2642_v13 }
 0x2e2   : > { %2607 = vmatpush2.bf16.msra.mxu0 %v4007_v48  ;;  %3660 = vmatpush3.bf16.msra.mxu1 %v2962_v33  ;;  %v3620_v48 = vld [vmem:[%s5562_s8] ss:$0 sm:$0xff] }
 0x2e3   : > { %2608 = vmatprep.subr.bf16.mxu0 %v4255_v58  ;;  %3661 = vmatprep.subr.bf16.mxu1 %v4256_v2 }
 0x2e4   : > { %3675 = vmatprep.mubr.msk.bf16.mxu1 %vm4257_vm3, %v4256_v2 }
 0x2e6   : > { %2609 = vmatpush2.bf16.msra.mxu0 %v4008_v25 }
 0x2e7   : > { %2836 = vmatprep.subr.bf16.mxu0 %v4255_v58 }
 0x2e9   : > { %2611 = vmatmul.mubr.bf16.vlgmr.msra.gmra.mxu0 %v2513_v52 }
 0x2ea   : > { %2837 = vmatpush1.bf16.msra.mxu0 %v4009_v4  ;;  %3618 = vmatprep.mubr.msk.bf16.mxu0 %vm677_vm0, %v2772_v5 }
 0x2eb   : > { %2838 = vmatprep.subr.bf16.mxu0 %v4255_v58 }
 0x2ee   : > { %2839 = vmatpush1.bf16.msra.mxu0 %v4010_v31 }
 0x2ef   : > { %2840 = vmatprep.subr.bf16.mxu0 %v4255_v58 }
 0x2f2   : > { %2841 = vmatpush1.bf16.msra.mxu0 %v4011_v7 }
 0x2f3   : > { %2842 = vmatprep.subr.bf16.mxu0 %v4255_v58 }
 0x2f6   : > { %2843 = vmatpush1.bf16.msra.mxu0 %v4012_v29 }
 0x2f7   : > { %2844 = vmatprep.subr.bf16.mxu0 %v4255_v58 }
 0x2fa   : > { %2845 = vmatpush1.bf16.msra.mxu0 %v4013_v8 }
 0x2fb   : > { %2846 = vmatprep.subr.bf16.mxu0 %v4255_v58 }
 0x2fe   : > { %2847 = vmatpush1.bf16.msra.mxu0 %v4014_v42 }
 0x2ff   : > { %2848 = vmatprep.subr.bf16.mxu0 %v4255_v58 }
 0x302   : > { %2849 = vmatpush1.bf16.msra.mxu0 %v4015_v21  ;;  %v3630_v21 = vld [vmem:[%s5564_s10] ss:$0 sm:$0xff] }
 0x303   : > { %2850 = vmatprep.subr.bf16.mxu0 %v4255_v58 }
 0x306   : > { %2851 = vmatpush1.bf16.msra.mxu0 %v4016_v18 }
 0x307   : > { %2864 = vmatprep.subr.bf16.mxu0 %v4255_v58 }
 0x30a   : > { %2865 = vmatpush2.bf16.msra.mxu0 %v4017_v16 }
 0x30b   : > { %2866 = vmatprep.subr.bf16.mxu0 %v4255_v58  ;;  %v4020_v58 = vld [vmem:[%s5561_s7 + $0x30] sm:$0xff]  }
 0x30c   : > { %3662 = vmatpush3.bf16.msra.mxu1 %v4020_v58 }
 0x30d   : > { %3663 = vmatprep.subr.bf16.mxu1 %v4256_v2 }
 0x30e   : > { %2867 = vmatpush2.bf16.msra.mxu0 %v4018_v10 }
 0x30f   : > { %3679 = vmatprep.subr.bf16.mxu0 %v4256_v2 }
 0x310   : > { %3664 = vmatpush3.bf16.msra.mxu1 %v4021_v1 }
 0x311   : > { %2869 = vmatmul.mubr.bf16.vlgmr.msra.gmra.mxu0 %v2771_v63  ;;  %3665 = vmatprep.subr.bf16.mxu1 %v4256_v2 }
 0x312   : > { %3691 = vmatprep.mubr.msk.bf16.mxu0 %vm4257_vm3, %v4256_v2  ;;  %3680 = vmatpush3.bf16.msra.mxu0 %v3066_v37 }
 0x313   : > { %3681 = vmatprep.subr.bf16.mxu0 %v4256_v2 }
 0x314   : > { %3666 = vmatpush3.bf16.msra.mxu1 %v4022_v54 }
 0x315   : > { %3667 = vmatprep.subr.bf16.mxu1 %v4256_v2 }
 0x316   : > { %3682 = vmatpush3.bf16.msra.mxu0 %v4028_v44 }
 0x317   : > { %3683 = vmatprep.subr.bf16.mxu0 %v4256_v2 }
 0x318   : > { %3668 = vmatpush3.bf16.msra.mxu1 %v4023_v9 }
 0x319   : > { %3669 = vmatprep.subr.bf16.mxu1 %v4256_v2 }
 0x31a   : > { %3684 = vmatpush3.bf16.msra.mxu0 %v4029_v24 }
 0x31b   : > { %3685 = vmatprep.subr.bf16.mxu0 %v4256_v2 }
 0x31c   : > { %3670 = vmatpush3.bf16.msra.mxu1 %v4024_v0 }
 0x31d   : > { %3671 = vmatprep.subr.bf16.mxu1 %v4256_v2 }
 0x31e   : > { %3686 = vmatpush3.bf16.msra.mxu0 %v4030_v28 }
 0x31f   : > { %3687 = vmatprep.subr.bf16.mxu0 %v4256_v2 }
 0x320   : > { %3672 = vmatpush3.bf16.msra.mxu1 %v4025_v46 }
 0x321   : > { %3673 = vmatprep.subr.bf16.mxu1 %v4256_v2 }
 0x322   : > { %3688 = vmatpush3.bf16.msra.mxu0 %v4031_v32 }
 0x323   : > { %3689 = vmatprep.subr.bf16.mxu0 %v4256_v2 }
 0x324   : > { %3674 = vmatpush3.bf16.msra.mxu1 %v4026_v62 }
 0x326   : > { %3690 = vmatpush3.bf16.msra.mxu0 %v4032_v47 }
 0x379   : > { %v2484_v49 = vpop.f32.mrf.mxu1 }
 0x37b   : > { %v2486_v26 = vpop.f32.mrf.mxu1 }
 0x37d   : > { %v2487_v11 = vpop.f32.mrf.mxu1 }
 0x37f   : > { %v2488_v19 = vpop.f32.mrf.mxu1 }
 0x381   : > { %v2381_v55 = vpop.f32.mrf.mxu0 }
 0x382   : > { %v2485_v20 = vadd.f32 %v2484_v49, %v2381_v55 }
 0x383   : > { %v2383_v38 = vpop.f32.mrf.mxu0 }
 0x385   : > { %v2384_v36 = vpop.f32.mrf.mxu0 }
 0x387   : > { %v2385_v34 = vpop.f32.mrf.mxu0 }
 0x3a1   : > { %v2741_v57 = vpop.f32.mrf.mxu1 }
 0x3a3   : > { %v2743_v53 = vpop.f32.mrf.mxu1 }
 0x3a5   : > { %v2744_v23 = vpop.f32.mrf.mxu1 }
 0x3a7   : > { %v2745_v45 = vpop.f32.mrf.mxu1 }
 0x3a9   : > { %v2612_v59 = vpop.f32.mrf.mxu0 }
 0x3aa   : > { %v2618_v39 = vadd.f32 %v2612_v59, %v2485_v20 }
 0x3ab   : > { %v2614_v27 = vpop.f32.mrf.mxu0 }
 0x3ac   : > { %v2747_v15 = vadd.f32 %v2741_v57, %v2618_v39 }
 0x3ad   : > { %v2615_v61 = vpop.f32.mrf.mxu0 }
 0x3af   : > { %v2616_v41 = vpop.f32.mrf.mxu0 }
 0x3d1   : > { %v2870_v14 = vpop.f32.mrf.mxu0 }
 0x3d2   : > { %v2876_v50 = vadd.f32 %v2870_v14, %v2747_v15 }
 0x3d3   : > { %v2872_v43 = vpop.f32.mrf.mxu0 }
 0x3d4   : > { %v2884_v51 = vadd.f32 %v3619_v56, %v2876_v50 }
 0x3d5   : > { %v2873_v3 = vpop.f32.mrf.mxu0 }
 0x3d6   : > { %v2885_v35 = vmul.f32 0.5, %v2884_v51 }
 0x3d7   : > { %v2874_v17 = vpop.f32.mrf.mxu0 }
 0x3d8   : > { %4185 = vtanh.f32 %v2885_v35 }
 0x3e5   : > { %v4186_v12 = vpop.eup %4185 }
 0x3e6   : > { %v2887_v22 = vadd.f32 1.0, %v4186_v12 }
 0x3e8   : > { %v2888_v30 = vmul.f32 0.5, %v2887_v22 }
 0x3ea   : > { %v2904_v6 = vpack.c.bf16 %v2888_v30, %v2888_v30 }
 0x3ec   : > { %3676 = vmatmul.mubr.msk.bf16.vlgmr.msra.gmra.mxu1 %vm2957_vm4, %v2904_v6 }
 0x4ac   : > { %v2998_v13 = vpop.f32.mrf.mxu1 }
 0x4ad   : > { %v2999_v25 = vadd.f32 %v3620_v48, %v2998_v13 }
 0x4ae   : > { %v3677_v4 = vpop.f32.mrf.mxu1 }
 0x4af   : > { %v3004_v52 = vmul.f32 0.5, %v2999_v25 }
 0x4b0   : > { %v3001_v5 = vpop.f32.mrf.mxu1 }
 0x4b1   : > { %4187 = vtanh.f32 %v3004_v52 }
 0x4b2   : > { %v3678_v31 = vpop.f32.mrf.mxu1 }
 0x4be   : > { %v4188_v7 = vpop.eup %4187 }
 0x4bf   : > { %v3006_v29 = vadd.f32 1.0, %v4188_v7 }
 0x4c1   : > { %v3007_v8 = vmul.f32 0.5, %v3006_v29 }
 0x4c3   : > { %v3019_v42 = vpack.c.bf16 %v3007_v8, %v3007_v8 }
 0x4c5   : > { %3692 = vmatmul.mubr.msk.bf16.vlgmr.msra.gmra.mxu0 %vm3060_vm6, %v3019_v42 }
 0x585   : > { %v3102_v18 = vpop.f32.mrf.mxu0 }
 0x586   : > { %v3103_v16 = vadd.f32 %v3630_v21, %v3102_v18 }
 0x587   : > { %v3693_v10 = vpop.f32.mrf.mxu0 }
 0x588   : > { %3108 = vmax.xlane.f32.xlu0 %v3103_v16 }
 0x589   : > { %v3105_v63 = vpop.f32.mrf.mxu0 }
 0x58b   : > { %v3694_v60 = vpop.f32.mrf.mxu0 }
 0x611   : > { %v3109_v2 = vpop.xlane.xlu0 %3108 }
 0x612   : > { %v3110_v33 = vsub.f32 %v3103_v16, %v3109_v2 }
 0x614   : > { %v3111_v58 = vmul.f32 1.442695, %v3110_v33 }
 0x616   : > { %4189 = vpow2.f32 %v3111_v58 }
 0x623   : > { %v4190_v1 = vpop.eup %4189 }
 0x624   : > { %3113 = vadd.xlane.f32.xlu0 %v4190_v1 }
 0x6ad   : > { %v3114_v54 = vpop.xlane.xlu0 %3113 }
 0x6ae   : > { %4191 = vrcp.f32 %v3114_v54 }
 0x6bb   : > { %v4192_v9 = vpop.eup %4191 }
 0x6bc   : > { %v3116_v0 = vmul.f32 %v4192_v9, %v4190_v1 }
 0x6be   : > { %3117 = vst [vmem:[%s382_s14] sm:$0xff] %v3116_v0 }
 0x6bf   : > { %4206 = shalt.err (!%p4203_p3)
}
 0x6c0   : > { %s4207_s29 = scalar_lea.hbm %s3130_s16, 128  ;;  %s4211_s14 = scalar_lea.hbm %s5565_s11, 256 }
 0x6c1   : > { %p4208_p4 = scmp.ne.s32.totalorder %s3130_s16, %s4207_s29  ;;  %p4212_p9 = scmp.lt.s32.totalorder %s3130_s16, %s5565_s11 }
 0x6c2   : > { %p4213_p10 = scmp.lt.s32.totalorder %s4211_s14, %s4207_s29 }
 0x6c3   : > { %p4209_p7 = pnand %p4208_p4, %p4357_p5 }
 0x6c4   : > { %p4214_p11 = por %p4213_p10, %p4212_p9 }
 0x6c5   : > { %p4210_p8 = pneg %p4209_p7 }
 0x6c7   : > { %p4215_p12 = pnand %p4214_p11, %p4210_p8 }
 0x6c9   : > { %4218 = shalt.err (!%p4215_p12)
}
 0x6ca   : > { %3695 = dma.vmem_to_hbm [thread:$0]  (%p4357_p5), %s3133_s15, 128, %s3130_s16, %s3119_s24  }
 0x6cb PF: > { %p3701_p13 = scmp.ge.s32.totalorder %s4253_s20, 2  ;;  %s3144_s0 = sand.u32 1, %s4241_s17  }
 0x6cc   : > { %s3145_s25 = scalar_lea.sflag [#allocation3], %s3144_s0 }
 0x6cd   : > { %p3698_p0 = pnand %p3701_p13, %p4361_p6 }
 0x6cf   : > { %p3699_p1 = pneg %p3698_p0 }
 0x6d1   : > { %4236 = dma.done.wait (%p3699_p1), %s3145_s25, 128  }
 0x6d2   : > { %4238 = vsyncadd (%p3699_p1), %s3145_s25, 4294967168  ;;  %s5571_s30 = sld [smem:[#allocation5_spill]]  ;;  %p21_p2 = scmp.ge.s32.totalorder %s4344_s23, 4  }
 0x6d3   : > { %s5572_s17 = smov %s4245_s18  ;;  %s5573_s18 = smov %s4249_s19 }
 0x6d4   : > { %s5575_s20 = smov %s4344_s23  ;;  %23 = sbr.rel (!%p21_p2) target bundleno = 5 (0x5), region = 107 }
 0x6d8   : > { %s5574_s19 = smov %s5571_s30 }
 0x6d9   :  { %3150 = vsyncpa [#allocation3], 1 }
 0x6da   :  { %3152 = vsyncpa [#allocation3 + $0x1], 1 }

</bundles_post_ra>
